<compile_context>
chip_gen: v7x
topology: tpu7x:2x2x1
jax: 0.10.0
libtpu: 0.0.40
codegen_flags: <defaults>
</compile_context>

<pallas_src>
import math
import jax
import jax.numpy as jnp
from jax.experimental import pallas as pl
from jax.experimental.pallas import tpu as pltpu

# ---------------- config (small, consistent with BertConfig) ----------------
B = 2            # batch
S = 8            # sequence length (shared by c and q streams)
H = 32           # hidden size
NUM_HEADS = 4
HEAD_DIM = H // NUM_HEADS
EPS = 1e-12


# --------------------------------- kernel -----------------------------------
def _de_attention_kernel(cin_ref, qin_ref, cmask_ref, qmask_ref,
                         wq_ref, bq_ref, wc_ref, bc_ref,
                         wd_ref, bd_ref, gamma_ref, beta_ref,
                         cout_ref, qout_ref, ctx_ref):
    Bk, Sk, Hk = cin_ref.shape
    dh = Hk // NUM_HEADS
    n_rows = Bk * Sk

    cin = cin_ref[...]                       # (B, S, H)
    qin = qin_ref[...]
    cin_flat = cin.reshape(n_rows, Hk)       # leading-dim reshape: free
    qin_flat = qin.reshape(n_rows, Hk)

    # ---- fused QKV projections: 2 wide matmuls instead of 6 small ones ----
    # wq = [query*scale | qkey | qvalue] (applied to qinput)
    # wc = [key | value | qquery*scale]  (applied to cinput)
    proj_q = jnp.dot(qin_flat, wq_ref[...],
                     preferred_element_type=jnp.float32) + bq_ref[...]   # (BS, 3H)
    proj_c = jnp.dot(cin_flat, wc_ref[...],
                     preferred_element_type=jnp.float32) + bc_ref[...]   # (BS, 3H)

    proj_q = proj_q.reshape(Bk, Sk, 3 * Hk)
    proj_c = proj_c.reshape(Bk, Sk, 3 * Hk)

    q_c = proj_q[:, :, 0:Hk]            # queries (c branch), pre-scaled
    k_q = proj_q[:, :, Hk:2 * Hk]       # keys    (q branch)
    v_q = proj_q[:, :, 2 * Hk:3 * Hk]   # values  (q branch)
    k_c = proj_c[:, :, 0:Hk]            # keys    (c branch)
    v_c = proj_c[:, :, Hk:2 * Hk]       # values  (c branch)
    q_q = proj_c[:, :, 2 * Hk:3 * Hk]   # queries (q branch), pre-scaled

    cmask = cmask_ref[...]              # (B, 1, S) additive mask over keys
    qmask = qmask_ref[...]

    def attend(q, k, v, mask, branch):
        # q,k,v: (B, S, H).  Batched over B via einsum; static unroll over heads.
        row0 = branch * n_rows
        for h in range(NUM_HEADS):
            sl = slice(h * dh, (h + 1) * dh)
            qh, kh, vh = q[:, :, sl], k[:, :, sl], v[:, :, sl]      # (B, S, dh)
            s = jnp.einsum('bqd,bkd->bqk', qh, kh,
                           preferred_element_type=jnp.float32)      # (B, S, S)
            s = s + mask                                            # bcast (B,1,S)
            s = s - jnp.max(s, axis=-1, keepdims=True)
            p = jnp.exp(s)
            p = p * pl.reciprocal(jnp.sum(p, axis=-1, keepdims=True), approx=True)
            ctx_h = jnp.einsum('bqk,bkd->bqd', p, vh,
                               preferred_element_type=jnp.float32)  # (B, S, dh)
            # write head context into the shared (2BS, H) scratch slab
            ctx_ref[row0:row0 + n_rows, sl] = ctx_h.reshape(n_rows, dh)

    attend(q_c, k_c, v_c, cmask, 0)     # c branch
    attend(q_q, k_q, v_q, qmask, 1)     # q branch

    # ---- fused output dense + residual + LayerNorm over both branches ----
    ctx_all = ctx_ref[...]                                        # (2BS, H)
    y = jnp.dot(ctx_all, wd_ref[...],
                preferred_element_type=jnp.float32) + bd_ref[...]
    # residual is cinput for BOTH branches (exactly as in the PyTorch forward)
    y = y + jnp.concatenate([cin_flat, cin_flat], axis=0)
    mu = jnp.mean(y, axis=-1, keepdims=True)
    yc = y - mu
    var = jnp.mean(yc * yc, axis=-1, keepdims=True)
    y = yc * jax.lax.rsqrt(var + EPS)
    y = y * gamma_ref[...] + beta_ref[...]

    cout_ref[...] = y[0:n_rows, :].reshape(Bk, Sk, Hk)
    qout_ref[...] = y[n_rows:2 * n_rows, :].reshape(Bk, Sk, Hk)


# --------------------------------- wrapper -----------------------------------
def bert_de_attention(cinput, qinput, attention_mask, qattention_mask, params):
    """cinput/qinput: (B, S, H); masks: (B, 1, 1, S) additive."""
    Bq, Sq, Hq = cinput.shape
    dh = Hq // NUM_HEADS
    scale = 1.0 / math.sqrt(dh)

    cmask = attention_mask.reshape(Bq, 1, Sq).astype(jnp.float32)
    qmask = qattention_mask.reshape(Bq, 1, Sq).astype(jnp.float32)

    # PyTorch nn.Linear: y = x @ W.T + b  -> pre-transpose weights to (in, out)
    def wt(name):
        return params[name + "_w"].T.astype(jnp.float32)

    def bias(name):
        return params[name + "_b"].astype(jnp.float32)

    # fold the 1/sqrt(head_dim) scale into the query projections
    w_from_q = jnp.concatenate([wt("query") * scale, wt("qkey"), wt("qvalue")], axis=1)
    b_from_q = jnp.concatenate(
        [bias("query") * scale, bias("qkey"), bias("qvalue")]).reshape(1, 3 * Hq)
    w_from_c = jnp.concatenate([wt("key"), wt("value"), wt("qquery") * scale], axis=1)
    b_from_c = jnp.concatenate(
        [bias("key"), bias("value"), bias("qquery") * scale]).reshape(1, 3 * Hq)

    operands = (
        cinput, qinput, cmask, qmask,
        w_from_q, b_from_q, w_from_c, b_from_c,
        wt("dense"), bias("dense").reshape(1, Hq),
        params["ln_gamma"].reshape(1, Hq).astype(jnp.float32),
        params["ln_beta"].reshape(1, Hq).astype(jnp.float32),
    )

    # grid collapsed to a single step: full-array blocks, everything in VMEM.
    hid_spec = pl.BlockSpec((Bq, Sq, Hq), lambda i: (0, 0, 0))
    mask_spec = pl.BlockSpec((Bq, 1, Sq), lambda i: (0, 0, 0))
    w3_spec = pl.BlockSpec((Hq, 3 * Hq), lambda i: (0, 0))
    b3_spec = pl.BlockSpec((1, 3 * Hq), lambda i: (0, 0))
    w_spec = pl.BlockSpec((Hq, Hq), lambda i: (0, 0))
    b_spec = pl.BlockSpec((1, Hq), lambda i: (0, 0))

    in_specs = [hid_spec, hid_spec, mask_spec, mask_spec,
                w3_spec, b3_spec, w3_spec, b3_spec,
                w_spec, b_spec, b_spec, b_spec]

    out_shape = (jax.ShapeDtypeStruct((Bq, Sq, Hq), jnp.float32),
                 jax.ShapeDtypeStruct((Bq, Sq, Hq), jnp.float32))

    return pl.pallas_call(
        _de_attention_kernel,
        out_shape=out_shape,
        grid_spec=pltpu.PrefetchScalarGridSpec(
            num_scalar_prefetch=0,
            grid=(1,),
            in_specs=in_specs,
            out_specs=[hid_spec, hid_spec],
            scratch_shapes=[pltpu.VMEM((2 * Bq * Sq, Hq), jnp.float32)],
        ),
        compiler_params=pltpu.CompilerParams(
            dimension_semantics=("arbitrary",)),
    )(*operands)


# ------------------------------ pure-JAX reference ---------------------------
def _reference(cinput, qinput, attention_mask, qattention_mask, params):
    def linear(x, name):
        return x @ params[name + "_w"].T + params[name + "_b"]

    def heads(x):
        b, s, _ = x.shape
        return x.reshape(b, s, NUM_HEADS, HEAD_DIM).transpose(0, 2, 1, 3)

    def attend(q_src, kv_src, qn, kn, vn, mask):
        q = heads(linear(q_src, qn))
        k = heads(linear(kv_src, kn))
        v = heads(linear(kv_src, vn))
        s = jnp.einsum("bhqd,bhkd->bhqk", q, k) / math.sqrt(HEAD_DIM) + mask
        p = jax.nn.softmax(s, axis=-1)
        ctx = jnp.einsum("bhqk,bhkd->bhqd", p, v)
        b, h, sq, d = ctx.shape
        return ctx.transpose(0, 2, 1, 3).reshape(b, sq, h * d)

    ctx_c = attend(qinput, cinput, "query", "key", "value", attention_mask)
    ctx_q = attend(cinput, qinput, "qquery", "qkey", "qvalue", qattention_mask)

    def out(x):
        y = linear(x, "dense") + cinput
        mu = jnp.mean(y, -1, keepdims=True)
        var = jnp.mean((y - mu) ** 2, -1, keepdims=True)
        return params["ln_gamma"] * (y - mu) / jnp.sqrt(var + EPS) + params["ln_beta"]

    return out(ctx_c), out(ctx_q)


# ----------------------------------- main ------------------------------------
if __name__ == "__main__":
    key = jax.random.PRNGKey(0)
    keys = jax.random.split(key, 16)

    def normal(k, shape, scale=0.05):
        return (scale * jax.random.normal(k, shape)).astype(jnp.float32)

    params = {
        "query_w": normal(keys[0], (H, H)),  "query_b": normal(keys[1], (H,)),
        "key_w":   normal(keys[2], (H, H)),  "key_b":   normal(keys[3], (H,)),
        "value_w": normal(keys[4], (H, H)),  "value_b": normal(keys[5], (H,)),
        "qquery_w": normal(keys[6], (H, H)), "qquery_b": normal(keys[7], (H,)),
        "qkey_w":   normal(keys[8], (H, H)), "qkey_b":   normal(keys[9], (H,)),
        "qvalue_w": normal(keys[10], (H, H)), "qvalue_b": normal(keys[11], (H,)),
        "dense_w": normal(keys[12], (H, H)), "dense_b": normal(keys[13], (H,)),
        "ln_gamma": jnp.ones((H,), jnp.float32),
        "ln_beta":  jnp.zeros((H,), jnp.float32),
    }
    # qdense / qLayerNorm params exist in the PyTorch module but are unused in
    # forward, so they are intentionally omitted here.

    kin = jax.random.split(keys[14], 4)
    cinput = jax.random.normal(kin[0], (B, S, H), jnp.float32)
    qinput = jax.random.normal(kin[1], (B, S, H), jnp.float32)
    # additive masks, PyTorch convention (0 = keep, -10000 = masked)
    cmask = jnp.where(jax.random.uniform(kin[2], (B, 1, 1, S)) < 0.2, -10000.0, 0.0)
    qmask = jnp.where(jax.random.uniform(kin[3], (B, 1, 1, S)) < 0.2, -10000.0, 0.0)
    cmask = cmask.astype(jnp.float32)
    qmask = qmask.astype(jnp.float32)

    c_out, q_out = bert_de_attention(cinput, qinput, cmask, qmask, params)
    jax.block_until_ready((c_out, q_out))

    c_ref, q_ref = _reference(cinput, qinput, cmask, qmask, params)
    assert jnp.allclose(c_out, c_ref, atol=1e-3, rtol=1e-3), "c branch mismatch"
    assert jnp.allclose(q_out, q_ref, atol=1e-3, rtol=1e-3), "q branch mismatch"

    print("KERNEL_OK")
</pallas_src>

<mosaic_0001>
module attributes {stable_mosaic.version = 11 : i64} {
  func.func @_de_attention_kernel(%arg0: i32, %arg1: memref<2x8x32xf32, #tpu.memory_space<vmem>>, %arg2: memref<2x8x32xf32, #tpu.memory_space<vmem>>, %arg3: memref<2x1x8xf32, #tpu.memory_space<vmem>>, %arg4: memref<2x1x8xf32, #tpu.memory_space<vmem>>, %arg5: memref<32x96xf32, #tpu.memory_space<vmem>>, %arg6: memref<1x96xf32, #tpu.memory_space<vmem>>, %arg7: memref<32x96xf32, #tpu.memory_space<vmem>>, %arg8: memref<1x96xf32, #tpu.memory_space<vmem>>, %arg9: memref<32x32xf32, #tpu.memory_space<vmem>>, %arg10: memref<1x32xf32, #tpu.memory_space<vmem>>, %arg11: memref<1x32xf32, #tpu.memory_space<vmem>>, %arg12: memref<1x32xf32, #tpu.memory_space<vmem>>, %arg13: memref<2x8x32xf32, #tpu.memory_space<vmem>>, %arg14: memref<2x8x32xf32, #tpu.memory_space<vmem>>, %arg15: memref<32x32xf32, #tpu.memory_space<vmem>>) attributes {dimension_semantics = [#tpu.dimension_semantics<arbitrary>], iteration_bounds = array<i64: 1>, scalar_prefetch = 0 : i64, scratch_operands = 1 : i64, tpu.core_type = #tpu.core_type<tc>, window_params = [{pipeline_mode = #tpu.pipeline_mode<synchronous>, transform_indices = @transform_0, window_bounds = array<i64: 2, 8, 32>}, {pipeline_mode = #tpu.pipeline_mode<synchronous>, transform_indices = @transform_1, window_bounds = array<i64: 2, 8, 32>}, {pipeline_mode = #tpu.pipeline_mode<synchronous>, transform_indices = @transform_2, window_bounds = array<i64: 2, 1, 8>}, {pipeline_mode = #tpu.pipeline_mode<synchronous>, transform_indices = @transform_3, window_bounds = array<i64: 2, 1, 8>}, {pipeline_mode = #tpu.pipeline_mode<synchronous>, transform_indices = @transform_4, window_bounds = array<i64: 32, 96>}, {pipeline_mode = #tpu.pipeline_mode<synchronous>, transform_indices = @transform_5, window_bounds = array<i64: 1, 96>}, {pipeline_mode = #tpu.pipeline_mode<synchronous>, transform_indices = @transform_6, window_bounds = array<i64: 32, 96>}, {pipeline_mode = #tpu.pipeline_mode<synchronous>, transform_indices = @transform_7, window_bounds = array<i64: 1, 96>}, {pipeline_mode = #tpu.pipeline_mode<synchronous>, transform_indices = @transform_8, window_bounds = array<i64: 32, 32>}, {pipeline_mode = #tpu.pipeline_mode<synchronous>, transform_indices = @transform_9, window_bounds = array<i64: 1, 32>}, {pipeline_mode = #tpu.pipeline_mode<synchronous>, transform_indices = @transform_10, window_bounds = array<i64: 1, 32>}, {pipeline_mode = #tpu.pipeline_mode<synchronous>, transform_indices = @transform_11, window_bounds = array<i64: 1, 32>}, {pipeline_mode = #tpu.pipeline_mode<synchronous>, transform_indices = @transform_12, window_bounds = array<i64: 2, 8, 32>}, {pipeline_mode = #tpu.pipeline_mode<synchronous>, transform_indices = @transform_13, window_bounds = array<i64: 2, 8, 32>}]} {
    %c0 = arith.constant 0 : index
    %c0_0 = arith.constant 0 : index
    %c0_1 = arith.constant 0 : index
    %0 = vector.load %arg1[%c0, %c0_0, %c0_1] : memref<2x8x32xf32, #tpu.memory_space<vmem>>, vector<2x8x32xf32>
    %c0_2 = arith.constant 0 : index
    %c0_3 = arith.constant 0 : index
    %c0_4 = arith.constant 0 : index
    %1 = vector.load %arg2[%c0_2, %c0_3, %c0_4] : memref<2x8x32xf32, #tpu.memory_space<vmem>>, vector<2x8x32xf32>
    %2 = vector.shape_cast %0 : vector<2x8x32xf32> to vector<16x32xf32>
    %3 = vector.shape_cast %1 : vector<2x8x32xf32> to vector<16x32xf32>
    %c0_5 = arith.constant 0 : index
    %c0_6 = arith.constant 0 : index
    %4 = vector.load %arg5[%c0_5, %c0_6] : memref<32x96xf32, #tpu.memory_space<vmem>>, vector<32x96xf32>
    %cst = arith.constant dense<0.000000e+00> : vector<16x96xf32>
    %5 = tpu.matmul %3, %4, %cst {dimension_numbers = #tpu.dot_dimension_numbers<[1], [0], [0], [1], [0, 0, 1, 1], [], []>} : vector<16x32xf32>, vector<32x96xf32>, vector<16x96xf32> -> vector<16x96xf32>
    %c0_7 = arith.constant 0 : index
    %c0_8 = arith.constant 0 : index
    %6 = vector.load %arg6[%c0_7, %c0_8] : memref<1x96xf32, #tpu.memory_space<vmem>>, vector<1x96xf32>
    %7 = vector.broadcast %6 : vector<1x96xf32> to vector<16x96xf32>
    %8 = arith.addf %5, %7 : vector<16x96xf32>
    %c0_9 = arith.constant 0 : index
    %c0_10 = arith.constant 0 : index
    %9 = vector.load %arg7[%c0_9, %c0_10] : memref<32x96xf32, #tpu.memory_space<vmem>>, vector<32x96xf32>
    %cst_11 = arith.constant dense<0.000000e+00> : vector<16x96xf32>
    %10 = tpu.matmul %2, %9, %cst_11 {dimension_numbers = #tpu.dot_dimension_numbers<[1], [0], [0], [1], [0, 0, 1, 1], [], []>} : vector<16x32xf32>, vector<32x96xf32>, vector<16x96xf32> -> vector<16x96xf32>
    %c0_12 = arith.constant 0 : index
    %c0_13 = arith.constant 0 : index
    %11 = vector.load %arg8[%c0_12, %c0_13] : memref<1x96xf32, #tpu.memory_space<vmem>>, vector<1x96xf32>
    %12 = vector.broadcast %11 : vector<1x96xf32> to vector<16x96xf32>
    %13 = arith.addf %10, %12 : vector<16x96xf32>
    %14 = vector.shape_cast %8 : vector<16x96xf32> to vector<2x8x96xf32>
    %15 = vector.shape_cast %13 : vector<16x96xf32> to vector<2x8x96xf32>
    %16 = vector.extract_strided_slice %14 {offsets = [0, 0, 0], sizes = [2, 8, 32], strides = [1, 1, 1]} : vector<2x8x96xf32> to vector<2x8x32xf32>
    %17 = vector.extract_strided_slice %14 {offsets = [0, 0, 32], sizes = [2, 8, 32], strides = [1, 1, 1]} : vector<2x8x96xf32> to vector<2x8x32xf32>
    %18 = vector.extract_strided_slice %14 {offsets = [0, 0, 64], sizes = [2, 8, 32], strides = [1, 1, 1]} : vector<2x8x96xf32> to vector<2x8x32xf32>
    %19 = vector.extract_strided_slice %15 {offsets = [0, 0, 0], sizes = [2, 8, 32], strides = [1, 1, 1]} : vector<2x8x96xf32> to vector<2x8x32xf32>
    %20 = vector.extract_strided_slice %15 {offsets = [0, 0, 32], sizes = [2, 8, 32], strides = [1, 1, 1]} : vector<2x8x96xf32> to vector<2x8x32xf32>
    %21 = vector.extract_strided_slice %15 {offsets = [0, 0, 64], sizes = [2, 8, 32], strides = [1, 1, 1]} : vector<2x8x96xf32> to vector<2x8x32xf32>
    %c0_14 = arith.constant 0 : index
    %c0_15 = arith.constant 0 : index
    %c0_16 = arith.constant 0 : index
    %22 = vector.load %arg3[%c0_14, %c0_15, %c0_16] : memref<2x1x8xf32, #tpu.memory_space<vmem>>, vector<2x1x8xf32>
    %c0_17 = arith.constant 0 : index
    %c0_18 = arith.constant 0 : index
    %c0_19 = arith.constant 0 : index
    %23 = vector.load %arg4[%c0_17, %c0_18, %c0_19] : memref<2x1x8xf32, #tpu.memory_space<vmem>>, vector<2x1x8xf32>
    %24 = vector.extract_strided_slice %16 {offsets = [0, 0, 0], sizes = [2, 8, 8], strides = [1, 1, 1]} : vector<2x8x32xf32> to vector<2x8x8xf32>
    %25 = vector.extract_strided_slice %19 {offsets = [0, 0, 0], sizes = [2, 8, 8], strides = [1, 1, 1]} : vector<2x8x32xf32> to vector<2x8x8xf32>
    %26 = vector.extract_strided_slice %20 {offsets = [0, 0, 0], sizes = [2, 8, 8], strides = [1, 1, 1]} : vector<2x8x32xf32> to vector<2x8x8xf32>
    "tpu.trace_start"() <{level = 10 : i32, message = "bqd,bkd->bqk"}> : () -> ()
    %cst_20 = arith.constant dense<0.000000e+00> : vector<2x8x8xf32>
    %27 = tpu.matmul %24, %25, %cst_20 {dimension_numbers = #tpu.dot_dimension_numbers<[2], [2], [1], [1], [0, 0, 0, 1, 1, 1], [0], [0]>} : vector<2x8x8xf32>, vector<2x8x8xf32>, vector<2x8x8xf32> -> vector<2x8x8xf32>
    "tpu.trace_stop"() : () -> ()
    %28 = vector.broadcast %22 : vector<2x1x8xf32> to vector<2x8x8xf32>
    %29 = arith.addf %27, %28 : vector<2x8x8xf32>
    %cst_21 = arith.constant dense<0xFF800000> : vector<2x8xf32>
    %30 = vector.multi_reduction <maximumf>, %29, %cst_21 [2] : vector<2x8x8xf32> to vector<2x8xf32>
    %31 = vector.shape_cast %30 : vector<2x8xf32> to vector<2x8x1xf32>
    %32 = vector.broadcast %31 : vector<2x8x1xf32> to vector<2x8x8xf32>
    %33 = arith.subf %29, %32 : vector<2x8x8xf32>
    %34 = math.exp %33 : vector<2x8x8xf32>
    %cst_22 = arith.constant dense<0.000000e+00> : vector<2x8xf32>
    %35 = vector.multi_reduction <add>, %34, %cst_22 [2] : vector<2x8x8xf32> to vector<2x8xf32>
    %36 = vector.shape_cast %35 : vector<2x8xf32> to vector<2x8x1xf32>
    %37 = tpu.reciprocal %36 {approx = true} : vector<2x8x1xf32> -> vector<2x8x1xf32>
    %38 = vector.broadcast %37 : vector<2x8x1xf32> to vector<2x8x8xf32>
    %39 = arith.mulf %34, %38 : vector<2x8x8xf32>
    "tpu.trace_start"() <{level = 10 : i32, message = "bqk,bkd->bqd"}> : () -> ()
    %cst_23 = arith.constant dense<0.000000e+00> : vector<2x8x8xf32>
    %40 = tpu.matmul %39, %26, %cst_23 {dimension_numbers = #tpu.dot_dimension_numbers<[2], [1], [1], [2], [0, 0, 0, 1, 1, 2], [0], [0]>} : vector<2x8x8xf32>, vector<2x8x8xf32>, vector<2x8x8xf32> -> vector<2x8x8xf32>
    "tpu.trace_stop"() : () -> ()
    %41 = vector.shape_cast %40 : vector<2x8x8xf32> to vector<16x8xf32>
    %c0_24 = arith.constant 0 : index
    %c0_25 = arith.constant 0 : index
    %42 = vector.load %arg15[%c0_24, %c0_25] : memref<32x32xf32, #tpu.memory_space<vmem>>, vector<16x8xf32>
    tpu.vector_store %arg15[%c0_24, %c0_25], %41 {strides = array<i32>} : memref<32x32xf32, #tpu.memory_space<vmem>>, vector<16x8xf32>,
    %43 = vector.extract_strided_slice %16 {offsets = [0, 0, 8], sizes = [2, 8, 8], strides = [1, 1, 1]} : vector<2x8x32xf32> to vector<2x8x8xf32>
    %44 = vector.extract_strided_slice %19 {offsets = [0, 0, 8], sizes = [2, 8, 8], strides = [1, 1, 1]} : vector<2x8x32xf32> to vector<2x8x8xf32>
    %45 = vector.extract_strided_slice %20 {offsets = [0, 0, 8], sizes = [2, 8, 8], strides = [1, 1, 1]} : vector<2x8x32xf32> to vector<2x8x8xf32>
    "tpu.trace_start"() <{level = 10 : i32, message = "bqd,bkd->bqk"}> : () -> ()
    %cst_26 = arith.constant dense<0.000000e+00> : vector<2x8x8xf32>
    %46 = tpu.matmul %43, %44, %cst_26 {dimension_numbers = #tpu.dot_dimension_numbers<[2], [2], [1], [1], [0, 0, 0, 1, 1, 1], [0], [0]>} : vector<2x8x8xf32>, vector<2x8x8xf32>, vector<2x8x8xf32> -> vector<2x8x8xf32>
    "tpu.trace_stop"() : () -> ()
    %47 = vector.broadcast %22 : vector<2x1x8xf32> to vector<2x8x8xf32>
    %48 = arith.addf %46, %47 : vector<2x8x8xf32>
    %cst_27 = arith.constant dense<0xFF800000> : vector<2x8xf32>
    %49 = vector.multi_reduction <maximumf>, %48, %cst_27 [2] : vector<2x8x8xf32> to vector<2x8xf32>
    %50 = vector.shape_cast %49 : vector<2x8xf32> to vector<2x8x1xf32>
    %51 = vector.broadcast %50 : vector<2x8x1xf32> to vector<2x8x8xf32>
    %52 = arith.subf %48, %51 : vector<2x8x8xf32>
    %53 = math.exp %52 : vector<2x8x8xf32>
    %cst_28 = arith.constant dense<0.000000e+00> : vector<2x8xf32>
    %54 = vector.multi_reduction <add>, %53, %cst_28 [2] : vector<2x8x8xf32> to vector<2x8xf32>
    %55 = vector.shape_cast %54 : vector<2x8xf32> to vector<2x8x1xf32>
    %56 = tpu.reciprocal %55 {approx = true} : vector<2x8x1xf32> -> vector<2x8x1xf32>
    %57 = vector.broadcast %56 : vector<2x8x1xf32> to vector<2x8x8xf32>
    %58 = arith.mulf %53, %57 : vector<2x8x8xf32>
    "tpu.trace_start"() <{level = 10 : i32, message = "bqk,bkd->bqd"}> : () -> ()
    %cst_29 = arith.constant dense<0.000000e+00> : vector<2x8x8xf32>
    %59 = tpu.matmul %58, %45, %cst_29 {dimension_numbers = #tpu.dot_dimension_numbers<[2], [1], [1], [2], [0, 0, 0, 1, 1, 2], [0], [0]>} : vector<2x8x8xf32>, vector<2x8x8xf32>, vector<2x8x8xf32> -> vector<2x8x8xf32>
    "tpu.trace_stop"() : () -> ()
    %60 = vector.shape_cast %59 : vector<2x8x8xf32> to vector<16x8xf32>
    %c0_30 = arith.constant 0 : index
    %c8 = arith.constant 8 : index
    %61 = vector.load %arg15[%c0_30, %c8] : memref<32x32xf32, #tpu.memory_space<vmem>>, vector<16x8xf32>
    tpu.vector_store %arg15[%c0_30, %c8], %60 {strides = array<i32>} : memref<32x32xf32, #tpu.memory_space<vmem>>, vector<16x8xf32>,
    %62 = vector.extract_strided_slice %16 {offsets = [0, 0, 16], sizes = [2, 8, 8], strides = [1, 1, 1]} : vector<2x8x32xf32> to vector<2x8x8xf32>
    %63 = vector.extract_strided_slice %19 {offsets = [0, 0, 16], sizes = [2, 8, 8], strides = [1, 1, 1]} : vector<2x8x32xf32> to vector<2x8x8xf32>
    %64 = vector.extract_strided_slice %20 {offsets = [0, 0, 16], sizes = [2, 8, 8], strides = [1, 1, 1]} : vector<2x8x32xf32> to vector<2x8x8xf32>
    "tpu.trace_start"() <{level = 10 : i32, message = "bqd,bkd->bqk"}> : () -> ()
    %cst_31 = arith.constant dense<0.000000e+00> : vector<2x8x8xf32>
    %65 = tpu.matmul %62, %63, %cst_31 {dimension_numbers = #tpu.dot_dimension_numbers<[2], [2], [1], [1], [0, 0, 0, 1, 1, 1], [0], [0]>} : vector<2x8x8xf32>, vector<2x8x8xf32>, vector<2x8x8xf32> -> vector<2x8x8xf32>
    "tpu.trace_stop"() : () -> ()
    %66 = vector.broadcast %22 : vector<2x1x8xf32> to vector<2x8x8xf32>
    %67 = arith.addf %65, %66 : vector<2x8x8xf32>
    %cst_32 = arith.constant dense<0xFF800000> : vector<2x8xf32>
    %68 = vector.multi_reduction <maximumf>, %67, %cst_32 [2] : vector<2x8x8xf32> to vector<2x8xf32>
    %69 = vector.shape_cast %68 : vector<2x8xf32> to vector<2x8x1xf32>
    %70 = vector.broadcast %69 : vector<2x8x1xf32> to vector<2x8x8xf32>
    %71 = arith.subf %67, %70 : vector<2x8x8xf32>
    %72 = math.exp %71 : vector<2x8x8xf32>
    %cst_33 = arith.constant dense<0.000000e+00> : vector<2x8xf32>
    %73 = vector.multi_reduction <add>, %72, %cst_33 [2] : vector<2x8x8xf32> to vector<2x8xf32>
    %74 = vector.shape_cast %73 : vector<2x8xf32> to vector<2x8x1xf32>
    %75 = tpu.reciprocal %74 {approx = true} : vector<2x8x1xf32> -> vector<2x8x1xf32>
    %76 = vector.broadcast %75 : vector<2x8x1xf32> to vector<2x8x8xf32>
    %77 = arith.mulf %72, %76 : vector<2x8x8xf32>
    "tpu.trace_start"() <{level = 10 : i32, message = "bqk,bkd->bqd"}> : () -> ()
    %cst_34 = arith.constant dense<0.000000e+00> : vector<2x8x8xf32>
    %78 = tpu.matmul %77, %64, %cst_34 {dimension_numbers = #tpu.dot_dimension_numbers<[2], [1], [1], [2], [0, 0, 0, 1, 1, 2], [0], [0]>} : vector<2x8x8xf32>, vector<2x8x8xf32>, vector<2x8x8xf32> -> vector<2x8x8xf32>
    "tpu.trace_stop"() : () -> ()
    %79 = vector.shape_cast %78 : vector<2x8x8xf32> to vector<16x8xf32>
    %c0_35 = arith.constant 0 : index
    %c16 = arith.constant 16 : index
    %80 = vector.load %arg15[%c0_35, %c16] : memref<32x32xf32, #tpu.memory_space<vmem>>, vector<16x8xf32>
    tpu.vector_store %arg15[%c0_35, %c16], %79 {strides = array<i32>} : memref<32x32xf32, #tpu.memory_space<vmem>>, vector<16x8xf32>,
    %81 = vector.extract_strided_slice %16 {offsets = [0, 0, 24], sizes = [2, 8, 8], strides = [1, 1, 1]} : vector<2x8x32xf32> to vector<2x8x8xf32>
    %82 = vector.extract_strided_slice %19 {offsets = [0, 0, 24], sizes = [2, 8, 8], strides = [1, 1, 1]} : vector<2x8x32xf32> to vector<2x8x8xf32>
    %83 = vector.extract_strided_slice %20 {offsets = [0, 0, 24], sizes = [2, 8, 8], strides = [1, 1, 1]} : vector<2x8x32xf32> to vector<2x8x8xf32>
    "tpu.trace_start"() <{level = 10 : i32, message = "bqd,bkd->bqk"}> : () -> ()
    %cst_36 = arith.constant dense<0.000000e+00> : vector<2x8x8xf32>
    %84 = tpu.matmul %81, %82, %cst_36 {dimension_numbers = #tpu.dot_dimension_numbers<[2], [2], [1], [1], [0, 0, 0, 1, 1, 1], [0], [0]>} : vector<2x8x8xf32>, vector<2x8x8xf32>, vector<2x8x8xf32> -> vector<2x8x8xf32>
    "tpu.trace_stop"() : () -> ()
    %85 = vector.broadcast %22 : vector<2x1x8xf32> to vector<2x8x8xf32>
    %86 = arith.addf %84, %85 : vector<2x8x8xf32>
    %cst_37 = arith.constant dense<0xFF800000> : vector<2x8xf32>
    %87 = vector.multi_reduction <maximumf>, %86, %cst_37 [2] : vector<2x8x8xf32> to vector<2x8xf32>
    %88 = vector.shape_cast %87 : vector<2x8xf32> to vector<2x8x1xf32>
    %89 = vector.broadcast %88 : vector<2x8x1xf32> to vector<2x8x8xf32>
    %90 = arith.subf %86, %89 : vector<2x8x8xf32>
    %91 = math.exp %90 : vector<2x8x8xf32>
    %cst_38 = arith.constant dense<0.000000e+00> : vector<2x8xf32>
    %92 = vector.multi_reduction <add>, %91, %cst_38 [2] : vector<2x8x8xf32> to vector<2x8xf32>
    %93 = vector.shape_cast %92 : vector<2x8xf32> to vector<2x8x1xf32>
    %94 = tpu.reciprocal %93 {approx = true} : vector<2x8x1xf32> -> vector<2x8x1xf32>
    %95 = vector.broadcast %94 : vector<2x8x1xf32> to vector<2x8x8xf32>
    %96 = arith.mulf %91, %95 : vector<2x8x8xf32>
    "tpu.trace_start"() <{level = 10 : i32, message = "bqk,bkd->bqd"}> : () -> ()
    %cst_39 = arith.constant dense<0.000000e+00> : vector<2x8x8xf32>
    %97 = tpu.matmul %96, %83, %cst_39 {dimension_numbers = #tpu.dot_dimension_numbers<[2], [1], [1], [2], [0, 0, 0, 1, 1, 2], [0], [0]>} : vector<2x8x8xf32>, vector<2x8x8xf32>, vector<2x8x8xf32> -> vector<2x8x8xf32>
    "tpu.trace_stop"() : () -> ()
    %98 = vector.shape_cast %97 : vector<2x8x8xf32> to vector<16x8xf32>
    %c0_40 = arith.constant 0 : index
    %c24 = arith.constant 24 : index
    %99 = vector.load %arg15[%c0_40, %c24] : memref<32x32xf32, #tpu.memory_space<vmem>>, vector<16x8xf32>
    tpu.vector_store %arg15[%c0_40, %c24], %98 {strides = array<i32>} : memref<32x32xf32, #tpu.memory_space<vmem>>, vector<16x8xf32>,
    %100 = vector.extract_strided_slice %21 {offsets = [0, 0, 0], sizes = [2, 8, 8], strides = [1, 1, 1]} : vector<2x8x32xf32> to vector<2x8x8xf32>
    %101 = vector.extract_strided_slice %17 {offsets = [0, 0, 0], sizes = [2, 8, 8], strides = [1, 1, 1]} : vector<2x8x32xf32> to vector<2x8x8xf32>
    %102 = vector.extract_strided_slice %18 {offsets = [0, 0, 0], sizes = [2, 8, 8], strides = [1, 1, 1]} : vector<2x8x32xf32> to vector<2x8x8xf32>
    "tpu.trace_start"() <{level = 10 : i32, message = "bqd,bkd->bqk"}> : () -> ()
    %cst_41 = arith.constant dense<0.000000e+00> : vector<2x8x8xf32>
    %103 = tpu.matmul %100, %101, %cst_41 {dimension_numbers = #tpu.dot_dimension_numbers<[2], [2], [1], [1], [0, 0, 0, 1, 1, 1], [0], [0]>} : vector<2x8x8xf32>, vector<2x8x8xf32>, vector<2x8x8xf32> -> vector<2x8x8xf32>
    "tpu.trace_stop"() : () -> ()
    %104 = vector.broadcast %23 : vector<2x1x8xf32> to vector<2x8x8xf32>
    %105 = arith.addf %103, %104 : vector<2x8x8xf32>
    %cst_42 = arith.constant dense<0xFF800000> : vector<2x8xf32>
    %106 = vector.multi_reduction <maximumf>, %105, %cst_42 [2] : vector<2x8x8xf32> to vector<2x8xf32>
    %107 = vector.shape_cast %106 : vector<2x8xf32> to vector<2x8x1xf32>
    %108 = vector.broadcast %107 : vector<2x8x1xf32> to vector<2x8x8xf32>
    %109 = arith.subf %105, %108 : vector<2x8x8xf32>
    %110 = math.exp %109 : vector<2x8x8xf32>
    %cst_43 = arith.constant dense<0.000000e+00> : vector<2x8xf32>
    %111 = vector.multi_reduction <add>, %110, %cst_43 [2] : vector<2x8x8xf32> to vector<2x8xf32>
    %112 = vector.shape_cast %111 : vector<2x8xf32> to vector<2x8x1xf32>
    %113 = tpu.reciprocal %112 {approx = true} : vector<2x8x1xf32> -> vector<2x8x1xf32>
    %114 = vector.broadcast %113 : vector<2x8x1xf32> to vector<2x8x8xf32>
    %115 = arith.mulf %110, %114 : vector<2x8x8xf32>
    "tpu.trace_start"() <{level = 10 : i32, message = "bqk,bkd->bqd"}> : () -> ()
    %cst_44 = arith.constant dense<0.000000e+00> : vector<2x8x8xf32>
    %116 = tpu.matmul %115, %102, %cst_44 {dimension_numbers = #tpu.dot_dimension_numbers<[2], [1], [1], [2], [0, 0, 0, 1, 1, 2], [0], [0]>} : vector<2x8x8xf32>, vector<2x8x8xf32>, vector<2x8x8xf32> -> vector<2x8x8xf32>
    "tpu.trace_stop"() : () -> ()
    %117 = vector.shape_cast %116 : vector<2x8x8xf32> to vector<16x8xf32>
    %c16_45 = arith.constant 16 : index
    %c0_46 = arith.constant 0 : index
    %118 = vector.load %arg15[%c16_45, %c0_46] : memref<32x32xf32, #tpu.memory_space<vmem>>, vector<16x8xf32>
    tpu.vector_store %arg15[%c16_45, %c0_46], %117 {strides = array<i32>} : memref<32x32xf32, #tpu.memory_space<vmem>>, vector<16x8xf32>,
    %119 = vector.extract_strided_slice %21 {offsets = [0, 0, 8], sizes = [2, 8, 8], strides = [1, 1, 1]} : vector<2x8x32xf32> to vector<2x8x8xf32>
    %120 = vector.extract_strided_slice %17 {offsets = [0, 0, 8], sizes = [2, 8, 8], strides = [1, 1, 1]} : vector<2x8x32xf32> to vector<2x8x8xf32>
    %121 = vector.extract_strided_slice %18 {offsets = [0, 0, 8], sizes = [2, 8, 8], strides = [1, 1, 1]} : vector<2x8x32xf32> to vector<2x8x8xf32>
    "tpu.trace_start"() <{level = 10 : i32, message = "bqd,bkd->bqk"}> : () -> ()
    %cst_47 = arith.constant dense<0.000000e+00> : vector<2x8x8xf32>
    %122 = tpu.matmul %119, %120, %cst_47 {dimension_numbers = #tpu.dot_dimension_numbers<[2], [2], [1], [1], [0, 0, 0, 1, 1, 1], [0], [0]>} : vector<2x8x8xf32>, vector<2x8x8xf32>, vector<2x8x8xf32> -> vector<2x8x8xf32>
    "tpu.trace_stop"() : () -> ()
    %123 = vector.broadcast %23 : vector<2x1x8xf32> to vector<2x8x8xf32>
    %124 = arith.addf %122, %123 : vector<2x8x8xf32>
    %cst_48 = arith.constant dense<0xFF800000> : vector<2x8xf32>
    %125 = vector.multi_reduction <maximumf>, %124, %cst_48 [2] : vector<2x8x8xf32> to vector<2x8xf32>
    %126 = vector.shape_cast %125 : vector<2x8xf32> to vector<2x8x1xf32>
    %127 = vector.broadcast %126 : vector<2x8x1xf32> to vector<2x8x8xf32>
    %128 = arith.subf %124, %127 : vector<2x8x8xf32>
    %129 = math.exp %128 : vector<2x8x8xf32>
    %cst_49 = arith.constant dense<0.000000e+00> : vector<2x8xf32>
    %130 = vector.multi_reduction <add>, %129, %cst_49 [2] : vector<2x8x8xf32> to vector<2x8xf32>
    %131 = vector.shape_cast %130 : vector<2x8xf32> to vector<2x8x1xf32>
    %132 = tpu.reciprocal %131 {approx = true} : vector<2x8x1xf32> -> vector<2x8x1xf32>
    %133 = vector.broadcast %132 : vector<2x8x1xf32> to vector<2x8x8xf32>
    %134 = arith.mulf %129, %133 : vector<2x8x8xf32>
    "tpu.trace_start"() <{level = 10 : i32, message = "bqk,bkd->bqd"}> : () -> ()
    %cst_50 = arith.constant dense<0.000000e+00> : vector<2x8x8xf32>
    %135 = tpu.matmul %134, %121, %cst_50 {dimension_numbers = #tpu.dot_dimension_numbers<[2], [1], [1], [2], [0, 0, 0, 1, 1, 2], [0], [0]>} : vector<2x8x8xf32>, vector<2x8x8xf32>, vector<2x8x8xf32> -> vector<2x8x8xf32>
    "tpu.trace_stop"() : () -> ()
    %136 = vector.shape_cast %135 : vector<2x8x8xf32> to vector<16x8xf32>
    %c16_51 = arith.constant 16 : index
    %c8_52 = arith.constant 8 : index
    %137 = vector.load %arg15[%c16_51, %c8_52] : memref<32x32xf32, #tpu.memory_space<vmem>>, vector<16x8xf32>
    tpu.vector_store %arg15[%c16_51, %c8_52], %136 {strides = array<i32>} : memref<32x32xf32, #tpu.memory_space<vmem>>, vector<16x8xf32>,
    %138 = vector.extract_strided_slice %21 {offsets = [0, 0, 16], sizes = [2, 8, 8], strides = [1, 1, 1]} : vector<2x8x32xf32> to vector<2x8x8xf32>
    %139 = vector.extract_strided_slice %17 {offsets = [0, 0, 16], sizes = [2, 8, 8], strides = [1, 1, 1]} : vector<2x8x32xf32> to vector<2x8x8xf32>
    %140 = vector.extract_strided_slice %18 {offsets = [0, 0, 16], sizes = [2, 8, 8], strides = [1, 1, 1]} : vector<2x8x32xf32> to vector<2x8x8xf32>
    "tpu.trace_start"() <{level = 10 : i32, message = "bqd,bkd->bqk"}> : () -> ()
    %cst_53 = arith.constant dense<0.000000e+00> : vector<2x8x8xf32>
    %141 = tpu.matmul %138, %139, %cst_53 {dimension_numbers = #tpu.dot_dimension_numbers<[2], [2], [1], [1], [0, 0, 0, 1, 1, 1], [0], [0]>} : vector<2x8x8xf32>, vector<2x8x8xf32>, vector<2x8x8xf32> -> vector<2x8x8xf32>
    "tpu.trace_stop"() : () -> ()
    %142 = vector.broadcast %23 : vector<2x1x8xf32> to vector<2x8x8xf32>
    %143 = arith.addf %141, %142 : vector<2x8x8xf32>
    %cst_54 = arith.constant dense<0xFF800000> : vector<2x8xf32>
    %144 = vector.multi_reduction <maximumf>, %143, %cst_54 [2] : vector<2x8x8xf32> to vector<2x8xf32>
    %145 = vector.shape_cast %144 : vector<2x8xf32> to vector<2x8x1xf32>
    %146 = vector.broadcast %145 : vector<2x8x1xf32> to vector<2x8x8xf32>
    %147 = arith.subf %143, %146 : vector<2x8x8xf32>
    %148 = math.exp %147 : vector<2x8x8xf32>
    %cst_55 = arith.constant dense<0.000000e+00> : vector<2x8xf32>
    %149 = vector.multi_reduction <add>, %148, %cst_55 [2] : vector<2x8x8xf32> to vector<2x8xf32>
    %150 = vector.shape_cast %149 : vector<2x8xf32> to vector<2x8x1xf32>
    %151 = tpu.reciprocal %150 {approx = true} : vector<2x8x1xf32> -> vector<2x8x1xf32>
    %152 = vector.broadcast %151 : vector<2x8x1xf32> to vector<2x8x8xf32>
    %153 = arith.mulf %148, %152 : vector<2x8x8xf32>
    "tpu.trace_start"() <{level = 10 : i32, message = "bqk,bkd->bqd"}> : () -> ()
    %cst_56 = arith.constant dense<0.000000e+00> : vector<2x8x8xf32>
    %154 = tpu.matmul %153, %140, %cst_56 {dimension_numbers = #tpu.dot_dimension_numbers<[2], [1], [1], [2], [0, 0, 0, 1, 1, 2], [0], [0]>} : vector<2x8x8xf32>, vector<2x8x8xf32>, vector<2x8x8xf32> -> vector<2x8x8xf32>
    "tpu.trace_stop"() : () -> ()
    %155 = vector.shape_cast %154 : vector<2x8x8xf32> to vector<16x8xf32>
    %c16_57 = arith.constant 16 : index
    %c16_58 = arith.constant 16 : index
    %156 = vector.load %arg15[%c16_57, %c16_58] : memref<32x32xf32, #tpu.memory_space<vmem>>, vector<16x8xf32>
    tpu.vector_store %arg15[%c16_57, %c16_58], %155 {strides = array<i32>} : memref<32x32xf32, #tpu.memory_space<vmem>>, vector<16x8xf32>,
    %157 = vector.extract_strided_slice %21 {offsets = [0, 0, 24], sizes = [2, 8, 8], strides = [1, 1, 1]} : vector<2x8x32xf32> to vector<2x8x8xf32>
    %158 = vector.extract_strided_slice %17 {offsets = [0, 0, 24], sizes = [2, 8, 8], strides = [1, 1, 1]} : vector<2x8x32xf32> to vector<2x8x8xf32>
    %159 = vector.extract_strided_slice %18 {offsets = [0, 0, 24], sizes = [2, 8, 8], strides = [1, 1, 1]} : vector<2x8x32xf32> to vector<2x8x8xf32>
    "tpu.trace_start"() <{level = 10 : i32, message = "bqd,bkd->bqk"}> : () -> ()
    %cst_59 = arith.constant dense<0.000000e+00> : vector<2x8x8xf32>
    %160 = tpu.matmul %157, %158, %cst_59 {dimension_numbers = #tpu.dot_dimension_numbers<[2], [2], [1], [1], [0, 0, 0, 1, 1, 1], [0], [0]>} : vector<2x8x8xf32>, vector<2x8x8xf32>, vector<2x8x8xf32> -> vector<2x8x8xf32>
    "tpu.trace_stop"() : () -> ()
    %161 = vector.broadcast %23 : vector<2x1x8xf32> to vector<2x8x8xf32>
    %162 = arith.addf %160, %161 : vector<2x8x8xf32>
    %cst_60 = arith.constant dense<0xFF800000> : vector<2x8xf32>
    %163 = vector.multi_reduction <maximumf>, %162, %cst_60 [2] : vector<2x8x8xf32> to vector<2x8xf32>
    %164 = vector.shape_cast %163 : vector<2x8xf32> to vector<2x8x1xf32>
    %165 = vector.broadcast %164 : vector<2x8x1xf32> to vector<2x8x8xf32>
    %166 = arith.subf %162, %165 : vector<2x8x8xf32>
    %167 = math.exp %166 : vector<2x8x8xf32>
    %cst_61 = arith.constant dense<0.000000e+00> : vector<2x8xf32>
    %168 = vector.multi_reduction <add>, %167, %cst_61 [2] : vector<2x8x8xf32> to vector<2x8xf32>
    %169 = vector.shape_cast %168 : vector<2x8xf32> to vector<2x8x1xf32>
    %170 = tpu.reciprocal %169 {approx = true} : vector<2x8x1xf32> -> vector<2x8x1xf32>
    %171 = vector.broadcast %170 : vector<2x8x1xf32> to vector<2x8x8xf32>
    %172 = arith.mulf %167, %171 : vector<2x8x8xf32>
    "tpu.trace_start"() <{level = 10 : i32, message = "bqk,bkd->bqd"}> : () -> ()
    %cst_62 = arith.constant dense<0.000000e+00> : vector<2x8x8xf32>
    %173 = tpu.matmul %172, %159, %cst_62 {dimension_numbers = #tpu.dot_dimension_numbers<[2], [1], [1], [2], [0, 0, 0, 1, 1, 2], [0], [0]>} : vector<2x8x8xf32>, vector<2x8x8xf32>, vector<2x8x8xf32> -> vector<2x8x8xf32>
    "tpu.trace_stop"() : () -> ()
    %174 = vector.shape_cast %173 : vector<2x8x8xf32> to vector<16x8xf32>
    %c16_63 = arith.constant 16 : index
    %c24_64 = arith.constant 24 : index
    %175 = vector.load %arg15[%c16_63, %c24_64] : memref<32x32xf32, #tpu.memory_space<vmem>>, vector<16x8xf32>
    tpu.vector_store %arg15[%c16_63, %c24_64], %174 {strides = array<i32>} : memref<32x32xf32, #tpu.memory_space<vmem>>, vector<16x8xf32>,
    %c0_65 = arith.constant 0 : index
    %c0_66 = arith.constant 0 : index
    %176 = vector.load %arg15[%c0_65, %c0_66] : memref<32x32xf32, #tpu.memory_space<vmem>>, vector<32x32xf32>
    %c0_67 = arith.constant 0 : index
    %c0_68 = arith.constant 0 : index
    %177 = vector.load %arg9[%c0_67, %c0_68] : memref<32x32xf32, #tpu.memory_space<vmem>>, vector<32x32xf32>
    %cst_69 = arith.constant dense<0.000000e+00> : vector<32x32xf32>
    %178 = tpu.matmul %176, %177, %cst_69 {dimension_numbers = #tpu.dot_dimension_numbers<[1], [0], [0], [1], [0, 0, 1, 1], [], []>} : vector<32x32xf32>, vector<32x32xf32>, vector<32x32xf32> -> vector<32x32xf32>
    %c0_70 = arith.constant 0 : index
    %c0_71 = arith.constant 0 : index
    %179 = vector.load %arg10[%c0_70, %c0_71] : memref<1x32xf32, #tpu.memory_space<vmem>>, vector<1x32xf32>
    %180 = vector.broadcast %179 : vector<1x32xf32> to vector<32x32xf32>
    %181 = arith.addf %178, %180 : vector<32x32xf32>
    %182 = tpu.concatenate %2, %2 in 0 : vector<16x32xf32>, vector<16x32xf32> -> vector<32x32xf32>
    %183 = arith.addf %181, %182 : vector<32x32xf32>
    %cst_72 = arith.constant dense<0.000000e+00> : vector<32xf32>
    %184 = vector.multi_reduction <add>, %183, %cst_72 [1] : vector<32x32xf32> to vector<32xf32>
    %185 = vector.shape_cast %184 : vector<32xf32> to vector<32x1xf32>
    %cst_73 = arith.constant 3.200000e+01 : f32
    %186 = vector.broadcast %cst_73 : f32 to vector<32x1xf32>
    %187 = arith.divf %185, %186 : vector<32x1xf32>
    %188 = vector.broadcast %187 : vector<32x1xf32> to vector<32x32xf32>
    %189 = arith.subf %183, %188 : vector<32x32xf32>
    %190 = arith.mulf %189, %189 : vector<32x32xf32>
    %cst_74 = arith.constant dense<0.000000e+00> : vector<32xf32>
    %191 = vector.multi_reduction <add>, %190, %cst_74 [1] : vector<32x32xf32> to vector<32xf32>
    %192 = vector.shape_cast %191 : vector<32xf32> to vector<32x1xf32>
    %cst_75 = arith.constant 3.200000e+01 : f32
    %193 = vector.broadcast %cst_75 : f32 to vector<32x1xf32>
    %194 = arith.divf %192, %193 : vector<32x1xf32>
    %cst_76 = arith.constant 9.99999996E-13 : f32
    %195 = vector.broadcast %cst_76 : f32 to vector<32x1xf32>
    %196 = arith.addf %194, %195 : vector<32x1xf32>
    %197 = math.rsqrt %196 : vector<32x1xf32>
    %198 = vector.broadcast %197 : vector<32x1xf32> to vector<32x32xf32>
    %199 = arith.mulf %189, %198 : vector<32x32xf32>
    %c0_77 = arith.constant 0 : index
    %c0_78 = arith.constant 0 : index
    %200 = vector.load %arg11[%c0_77, %c0_78] : memref<1x32xf32, #tpu.memory_space<vmem>>, vector<1x32xf32>
    %201 = vector.broadcast %200 : vector<1x32xf32> to vector<32x32xf32>
    %202 = arith.mulf %199, %201 : vector<32x32xf32>
    %c0_79 = arith.constant 0 : index
    %c0_80 = arith.constant 0 : index
    %203 = vector.load %arg12[%c0_79, %c0_80] : memref<1x32xf32, #tpu.memory_space<vmem>>, vector<1x32xf32>
    %204 = vector.broadcast %203 : vector<1x32xf32> to vector<32x32xf32>
    %205 = arith.addf %202, %204 : vector<32x32xf32>
    %206 = vector.extract_strided_slice %205 {offsets = [0, 0], sizes = [16, 32], strides = [1, 1]} : vector<32x32xf32> to vector<16x32xf32>
    %207 = vector.shape_cast %206 : vector<16x32xf32> to vector<2x8x32xf32>
    %c0_81 = arith.constant 0 : index
    %c0_82 = arith.constant 0 : index
    %c0_83 = arith.constant 0 : index
    %208 = vector.load %arg13[%c0_81, %c0_82, %c0_83] : memref<2x8x32xf32, #tpu.memory_space<vmem>>, vector<2x8x32xf32>
    tpu.vector_store %arg13[%c0_81, %c0_82, %c0_83], %207 {strides = array<i32>} : memref<2x8x32xf32, #tpu.memory_space<vmem>>, vector<2x8x32xf32>,
    %209 = vector.extract_strided_slice %205 {offsets = [16, 0], sizes = [16, 32], strides = [1, 1]} : vector<32x32xf32> to vector<16x32xf32>
    %210 = vector.shape_cast %209 : vector<16x32xf32> to vector<2x8x32xf32>
    %c0_84 = arith.constant 0 : index
    %c0_85 = arith.constant 0 : index
    %c0_86 = arith.constant 0 : index
    %211 = vector.load %arg14[%c0_84, %c0_85, %c0_86] : memref<2x8x32xf32, #tpu.memory_space<vmem>>, vector<2x8x32xf32>
    tpu.vector_store %arg14[%c0_84, %c0_85, %c0_86], %210 {strides = array<i32>} : memref<2x8x32xf32, #tpu.memory_space<vmem>>, vector<2x8x32xf32>,
    return
  }
  func.func @transform_0(%arg0: i32) -> (i32, i32, i32) {
    %c0_i32 = arith.constant 0 : i32
    %c0_i32_0 = arith.constant 0 : i32
    %c0_i32_1 = arith.constant 0 : i32
    %c0_i32_2 = arith.constant 0 : i32
    return %c0_i32, %c0_i32_0, %c0_i32_1 : i32, i32, i32
  }
  func.func @transform_1(%arg0: i32) -> (i32, i32, i32) {
    %c0_i32 = arith.constant 0 : i32
    %c0_i32_0 = arith.constant 0 : i32
    %c0_i32_1 = arith.constant 0 : i32
    %c0_i32_2 = arith.constant 0 : i32
    return %c0_i32, %c0_i32_0, %c0_i32_1 : i32, i32, i32
  }
  func.func @transform_2(%arg0: i32) -> (i32, i32, i32) {
    %c0_i32 = arith.constant 0 : i32
    %c0_i32_0 = arith.constant 0 : i32
    %c0_i32_1 = arith.constant 0 : i32
    %c0_i32_2 = arith.constant 0 : i32
    return %c0_i32, %c0_i32_0, %c0_i32_1 : i32, i32, i32
  }
  func.func @transform_3(%arg0: i32) -> (i32, i32, i32) {
    %c0_i32 = arith.constant 0 : i32
    %c0_i32_0 = arith.constant 0 : i32
    %c0_i32_1 = arith.constant 0 : i32
    %c0_i32_2 = arith.constant 0 : i32
    return %c0_i32, %c0_i32_0, %c0_i32_1 : i32, i32, i32
  }
  func.func @transform_4(%arg0: i32) -> (i32, i32) {
    %c0_i32 = arith.constant 0 : i32
    %c0_i32_0 = arith.constant 0 : i32
    %c0_i32_1 = arith.constant 0 : i32
    return %c0_i32, %c0_i32_0 : i32, i32
  }
  func.func @transform_5(%arg0: i32) -> (i32, i32) {
    %c0_i32 = arith.constant 0 : i32
    %c0_i32_0 = arith.constant 0 : i32
    %c0_i32_1 = arith.constant 0 : i32
    return %c0_i32, %c0_i32_0 : i32, i32
  }
  func.func @transform_6(%arg0: i32) -> (i32, i32) {
    %c0_i32 = arith.constant 0 : i32
    %c0_i32_0 = arith.constant 0 : i32
    %c0_i32_1 = arith.constant 0 : i32
    return %c0_i32, %c0_i32_0 : i32, i32
  }
  func.func @transform_7(%arg0: i32) -> (i32, i32) {
    %c0_i32 = arith.constant 0 : i32
    %c0_i32_0 = arith.constant 0 : i32
    %c0_i32_1 = arith.constant 0 : i32
    return %c0_i32, %c0_i32_0 : i32, i32
  }
  func.func @transform_8(%arg0: i32) -> (i32, i32) {
    %c0_i32 = arith.constant 0 : i32
    %c0_i32_0 = arith.constant 0 : i32
    %c0_i32_1 = arith.constant 0 : i32
    return %c0_i32, %c0_i32_0 : i32, i32
  }
  func.func @transform_9(%arg0: i32) -> (i32, i32) {
    %c0_i32 = arith.constant 0 : i32
    %c0_i32_0 = arith.constant 0 : i32
    %c0_i32_1 = arith.constant 0 : i32
    return %c0_i32, %c0_i32_0 : i32, i32
  }
  func.func @transform_10(%arg0: i32) -> (i32, i32) {
    %c0_i32 = arith.constant 0 : i32
    %c0_i32_0 = arith.constant 0 : i32
    %c0_i32_1 = arith.constant 0 : i32
    return %c0_i32, %c0_i32_0 : i32, i32
  }
  func.func @transform_11(%arg0: i32) -> (i32, i32) {
    %c0_i32 = arith.constant 0 : i32
    %c0_i32_0 = arith.constant 0 : i32
    %c0_i32_1 = arith.constant 0 : i32
    return %c0_i32, %c0_i32_0 : i32, i32
  }
  func.func @transform_12(%arg0: i32) -> (i32, i32, i32) {
    %c0_i32 = arith.constant 0 : i32
    %c0_i32_0 = arith.constant 0 : i32
    %c0_i32_1 = arith.constant 0 : i32
    %c0_i32_2 = arith.constant 0 : i32
    return %c0_i32, %c0_i32_0, %c0_i32_1 : i32, i32, i32
  }
  func.func @transform_13(%arg0: i32) -> (i32, i32, i32) {
    %c0_i32 = arith.constant 0 : i32
    %c0_i32_0 = arith.constant 0 : i32
    %c0_i32_1 = arith.constant 0 : i32
    %c0_i32_2 = arith.constant 0 : i32
    return %c0_i32, %c0_i32_0, %c0_i32_1 : i32, i32, i32
  }
}

</mosaic_0001>

<bundles_post_ra>
// kernel: tpu_custom_call.1
= control target key start
LH: loop header
LB: loop body
LE: loop exit
PB: predicated region body
PF: predicated region fallthrough
CT: control target
= control target key end

     0   :  { %19 = vsyncpa [#allocation4], 0  ;;  %s4511_s0 = inlined_call_operand.hbm [shape: f32[2,8,32], index: 0, kind: input, shape index: {}]   ;;  %s4512_s1 = inlined_call_operand.hbm [shape: f32[2,8,32], index: 1, kind: input, shape index: {}]   ;;  %s4513_s2 = inlined_call_operand.vmem [shape: f32[2,1,8], index: 2, kind: input, shape index: {}]   ;;  %s4514_s3 = inlined_call_operand.vmem [shape: f32[2,1,8], index: 3, kind: input, shape index: {}]   ;;  %s4515_s4 = inlined_call_operand.hbm [shape: f32[32,96], index: 4, kind: input, shape index: {}]   ;;  %s4516_s5 = inlined_call_operand.vmem [shape: f32[1,96], index: 5, kind: input, shape index: {}]   ;;  %s4517_s6 = inlined_call_operand.hbm [shape: f32[32,96], index: 6, kind: input, shape index: {}]   ;;  %s4518_s7 = inlined_call_operand.vmem [shape: f32[1,96], index: 7, kind: input, shape index: {}]   ;;  %s4519_s8 = inlined_call_operand.hbm [shape: f32[32,32], index: 8, kind: input, shape index: {}]   ;;  %s4520_s9 = inlined_call_operand.vmem [shape: f32[1,32], index: 9, kind: input, shape index: {}]   ;;  %s4521_s10 = inlined_call_operand.vmem [shape: f32[1,32], index: 10, kind: input, shape index: {}]   ;;  %s4522_s11 = inlined_call_operand.vmem [shape: f32[1,32], index: 11, kind: input, shape index: {}]   ;;  %s4523_s12 = inlined_call_operand.hbm [shape: f32[2,8,32], index: 12, kind: output, shape index: {0}]   ;;  %s4524_s13 = inlined_call_operand.hbm [shape: f32[2,8,32], index: 13, kind: output, shape index: {1}]  }
   0x1   :  { %20 = vsyncpa [#allocation7], 0 }
   0x2   :  { %21 = vsyncpa [#allocation10], 0 }
   0x3   :  { %22 = vsyncpa [#allocation5], 0 }
   0x4   :  { %23 = vsyncpa [#allocation14], 0  ;;  %s3895_s25 = smov [#allocation6]   ;;  %s3896_s27 = smov [#allocation9]  }
   0x5   :  { %s41_s26 = sshll.u32 %s3895_s25, 4  ;;  %s71_s28 = sshll.u32 %s3896_s27, 4  ;;  %s42_s26 = int_to_ptr.vmem [resolvable:$true] %s41_s26  ;;  %s3989_s28 = int_to_ptr.vmem [resolvable:$true] %s71_s28 }
   0x6   :  { %s3731_s14 = scalar_lea.hbm %s4512_s1, 256 }
   0x7   :  { %p3732_p0 = scmp.ne.s32.totalorder %s4512_s1, %s3731_s14  ;;  %p3735_p1 = scmp.lt.u32.totalorder %s3731_s14, %s4512_s1 }
   0x9   :  { %p3737_p2 = pnand %p3735_p1, %p3732_p0 }
   0xb   :  { %3740 = shalt.err (!%p3737_p2)
}
   0xc   :  { %s3741_s19 = scalar_lea.vmem %s42_s26, 256  ;;  %p3746_p4 = scmp.lt.s32.totalorder %s42_s26, %s42_s26 }
   0xd   :  { %p3742_p3 = scmp.ne.s32.totalorder %s42_s26, %s3741_s19  ;;  %p3747_p5 = scmp.lt.s32.totalorder %s3741_s19, %s3741_s19 }
   0xf   :  { %p3748_p6 = por %p3747_p5, %p3746_p4 }
  0x11   :  { %p3749_p7 = pnand %p3748_p6, %p3742_p3 }
  0x13   :  { %3752 = shalt.err (!%p3749_p7)
}
  0x14   :  { %s3897_s20 = smov 128   ;;  %s3898_s21 = smov 8  }
  0x15   :  { %47 = dma.hbm_to_vmem [thread:$0]  %s4512_s1, 256, %s42_s26, [#allocation7], %s3897_s20, %s3897_s20, %s3898_s21  }
  0x16   :  { %s3753_s27 = scalar_lea.hbm %s4517_s6, 512 }
  0x17   :  { %p3754_p8 = scmp.ne.s32.totalorder %s4517_s6, %s3753_s27  ;;  %p3757_p9 = scmp.lt.u32.totalorder %s3753_s27, %s4517_s6 }
  0x19   :  { %p3759_p10 = pnand %p3757_p9, %p3754_p8 }
  0x1b   :  { %3762 = shalt.err (!%p3759_p10)
}
  0x1c   :  { %s3763_s16 = scalar_lea.vmem %s3989_s28, 512  ;;  %p3768_p12 = scmp.lt.s32.totalorder %s3989_s28, %s3989_s28 }
  0x1d   :  { %p3764_p11 = scmp.ne.s32.totalorder %s3989_s28, %s3763_s16  ;;  %p3769_p13 = scmp.lt.s32.totalorder %s3763_s16, %s3763_s16 }
  0x1f   :  { %p3770_p0 = por %p3769_p13, %p3768_p12 }
  0x21   :  { %p3771_p1 = pnand %p3770_p0, %p3764_p11 }
  0x23   :  { %3774 = shalt.err (!%p3771_p1)
}
  0x24   :  { %77 = dma.hbm_to_vmem [thread:$0]  %s4517_s6, 512, %s3989_s28, [#allocation10], %s3897_s20, %s3897_s20, %s3898_s21  }
  0x25   :  { %s3899_s17 = smov [#allocation3]   ;;  %s3900_s19 = smov [#allocation8]  }
  0x26   :  { %s29_s18 = sshll.u32 %s3899_s17, 4  ;;  %s57_s22 = sshll.u32 %s3900_s19, 4  ;;  %s30_s18 = int_to_ptr.vmem [resolvable:$true] %s29_s18  ;;  %s4026_s22 = int_to_ptr.vmem [resolvable:$true] %s57_s22 }
  0x27   :  { %s3775_s25 = scalar_lea.hbm %s4511_s0, 256 }
  0x28   :  { %p3776_p2 = scmp.ne.s32.totalorder %s4511_s0, %s3775_s25  ;;  %p3779_p3 = scmp.lt.u32.totalorder %s3775_s25, %s4511_s0 }
  0x2a   :  { %p3781_p4 = pnand %p3779_p3, %p3776_p2 }
  0x2c   :  { %3784 = shalt.err (!%p3781_p4)
}
  0x2d   :  { %s3785_s6 = scalar_lea.vmem %s30_s18, 256  ;;  %p3790_p6 = scmp.lt.s32.totalorder %s30_s18, %s30_s18 }
  0x2e   :  { %p3786_p5 = scmp.ne.s32.totalorder %s30_s18, %s3785_s6  ;;  %p3791_p7 = scmp.lt.s32.totalorder %s3785_s6, %s3785_s6 }
  0x30   :  { %p3792_p8 = por %p3791_p7, %p3790_p6 }
  0x32   :  { %p3793_p9 = pnand %p3792_p8, %p3786_p5 }
  0x34   :  { %3796 = shalt.err (!%p3793_p9)
}
  0x35   :  { %35 = dma.hbm_to_vmem [thread:$0]  %s4511_s0, 256, %s30_s18, [#allocation4], %s3897_s20, %s3897_s20, %s3898_s21  }
  0x36   :  { %s3797_s26 = scalar_lea.hbm %s4515_s4, 512 }
  0x37   :  { %p3798_p10 = scmp.ne.s32.totalorder %s4515_s4, %s3797_s26  ;;  %p3801_p11 = scmp.lt.u32.totalorder %s3797_s26, %s4515_s4 }
  0x39   :  { %p3803_p12 = pnand %p3801_p11, %p3798_p10 }
  0x3b   :  { %3806 = shalt.err (!%p3803_p12)
}
  0x3c   :  { %s3807_s25 = scalar_lea.vmem %s4026_s22, 512  ;;  %p3812_p0 = scmp.lt.s32.totalorder %s4026_s22, %s4026_s22 }
  0x3d   :  { %p3808_p13 = scmp.ne.s32.totalorder %s4026_s22, %s3807_s25  ;;  %p3813_p1 = scmp.lt.s32.totalorder %s3807_s25, %s3807_s25 }
  0x3f   :  { %p3814_p2 = por %p3813_p1, %p3812_p0 }
  0x41   :  { %p3815_p3 = pnand %p3814_p2, %p3808_p13 }
  0x43   :  { %3818 = shalt.err (!%p3815_p3)
}
  0x44   :  { %63 = dma.hbm_to_vmem [thread:$0]  %s4515_s4, 512, %s4026_s22, [#allocation7], %s3897_s20, %s3897_s20, %s3898_s21  }
  0x45   :  { %s3901_s27 = smov [#allocation11]   ;;  %s3819_s6 = scalar_lea.hbm %s4519_s8, 512 }
  0x46   :  { %s85_s29 = sshll.u32 %s3901_s27, 4  ;;  %p3820_p4 = scmp.ne.s32.totalorder %s4519_s8, %s3819_s6  ;;  %s86_s29 = int_to_ptr.vmem [resolvable:$true] %s85_s29 }
  0x47   :  { %p3823_p5 = scmp.lt.u32.totalorder %s3819_s6, %s4519_s8 }
  0x49   :  { %p3825_p6 = pnand %p3823_p5, %p3820_p4 }
  0x4b   :  { %3828 = shalt.err (!%p3825_p6)
}
  0x4c   :  { %s3829_s26 = scalar_lea.vmem %s86_s29, 512  ;;  %p3834_p8 = scmp.lt.s32.totalorder %s86_s29, %s86_s29 }
  0x4d   :  { %p3830_p7 = scmp.ne.s32.totalorder %s86_s29, %s3829_s26  ;;  %p3835_p9 = scmp.lt.s32.totalorder %s3829_s26, %s3829_s26 }
  0x4f   :  { %p3836_p10 = por %p3835_p9, %p3834_p8 }
  0x51   :  { %p3837_p11 = pnand %p3836_p10, %p3830_p7 }
  0x53   :  { %3840 = shalt.err (!%p3837_p11)
}
  0x54   :  { %91 = dma.hbm_to_vmem [thread:$0]  %s4519_s8, 512, %s86_s29, [#allocation10], %s3897_s20, %s3897_s20, %s3898_s21  }
  0x55   :  { %3885 = dma.done.wait [#allocation4], 256  }
  0x56   :  { %3886 = vsyncadd [#allocation4], 4294967040 }
  0x57   :  { %3887 = dma.done.wait [#allocation7], 768  }
  0x58   :  { %3888 = vsyncadd [#allocation7], 4294966528 }
  0x59   :  { %3889 = dma.done.wait [#allocation10], 1024  }
  0x5a   :  { %3890 = vsyncadd [#allocation10], 4294966272  ;;  %vm128_vm0 = vcmask 261120   ;;  %v117_v0 = vld [vmem:[#allocation8] sm:$0xff]  ;;  %v118_v1 = vld [vmem:[#allocation8 + $0x8] sm:$0xff]  ;;  %v3902_v16 = vmov 0.0  }
  0x5b   :  { %v119_v2 = vld [vmem:[#allocation8 + $0x10] sm:$0xff]  ;;  %v3609_v3 = vpack.c.bf16 %v118_v1, %v117_v0  ;;  %v120_v4 = vld [vmem:[#allocation8 + $0x18] sm:$0xff]  ;;  %v210_v7 = vld [vmem:[#allocation9] sm:$0xff]  ;;  %3435 = vmatprep.subr.mxu0 %v3902_v16  ;;  %vm3903_vm1 = vmmov 0   ;;  %vm318_vm2 = vcmask 64512   ;;  %s3904_s24 = smov 96  }
  0x5c   :  { %v115_v5 = vld [vmem:[#allocation6] sm:$0xff]  ;;  %v3613_v6 = vpack.c.bf16 %v120_v4, %v119_v2  ;;  %v211_v8 = vld [vmem:[#allocation9 + $0x8] sm:$0xff]  ;;  %v213_v11 = vld [vmem:[#allocation9 + $0x18] sm:$0xff]  ;;  %3437 = vmatprep.mubr.msk.f32.mxu0 %vm3903_vm1, %v3902_v16  ;;  %s3907_s27 = smov 112   ;;  %s3908_s29 = smov 80   ;;  %vm985_vm3 = vcmask 130112  }
  0x5d   :  { %3421 = vmatprep.mubr.msk.f32.mxu1 %vm128_vm0, %v115_v5  ;;  %3610 = vmatprep.subr.bf16.mxu1 %v3609_v3  ;;  %v3617_v9 = vpack.c.bf16 %v211_v8, %v210_v7  ;;  %v212_v10 = vld [vmem:[#allocation9 + $0x10] sm:$0xff]  ;;  %v116_v12 = vld [vmem:[#allocation6 + $0x8] sm:$0xff]  ;;  %v113_v14 = vld [vmem:[#allocation3] sm:$0xff]  ;;  %s3909_s30 = smov 104   ;;  %s3910_s14 = smov 72   ;;  %vm1326_vm4 = vcmask 195712  }
  0x5e   :  { %3612 = vmatpush3.bf16.msra.mxu1 %v3609_v3  ;;  %v3621_v13 = vpack.c.bf16 %v213_v11, %v212_v10  ;;  %v114_v15 = vld [vmem:[#allocation3 + $0x8] sm:$0xff]  ;;  %v3267_v19 = vld [vmem:[%s4518_s7] ss:$0 sm:$0xff]  ;;  %v4131_v30 = vld [vmem:[%s4513_s2 + $0x1] ss:$0 sm:$0xff]  ;;  %s3911_s6 = smov 64  }
  0x5f   :  { %3614 = vmatprep.subr.bf16.mxu1 %v3613_v6  ;;  %v3264_v21 = vld [vmem:[%s4516_s5] ss:$0 sm:$0xff]  ;;  %s3905_s5 = smov 120   ;;  %s3913_s26 = smov 48   ;;  %vm1667_vm5 = vcmask 261312  }
  0x60   :  { %v4126_v28 = vld [vmem:[%s4513_s2] ss:$0 sm:$0xff]  ;;  %s3906_s2 = smov 88   ;;  %s3914_s4 = smov 40  }
  0x61   :  { %s3915_s22 = smov 16   ;;  %s3916_s8 = smov 24  }
  0x62   :  { %3616 = vmatpush3.bf16.msra.mxu1 %v3613_v6 }
  0x63   :  { %3618 = vmatprep.subr.bf16.mxu1 %v3617_v9 }
  0x65   :  { %3422 = vmatmul.mubr.msk.f32.vlgmr.msra.gmra.mrb[0].mxu1 %vm128_vm0, %v116_v12 }
  0x66   :  { %3620 = vmatpush3.bf16.msra.mxu1 %v3617_v9  ;;  %3432 = vmatprep.mubr.msk.f32.mxu1 %vm128_vm0, %v113_v14 }
  0x67   :  { %3622 = vmatprep.subr.bf16.mxu1 %v3621_v13 }
  0x6a   :  { %3624 = vmatpush3.bf16.msra.mxu1 %v3621_v13 }
  0x6b   :  { %3440 = vmatprep.subr.mxu1 %v3902_v16 }
  0x6d   :  { %3433 = vmatmul.mubr.msk.f32.vlgmr.msra.gmra.mrb[2].mxu1 %vm128_vm0, %v114_v15 }
  0x6e   :  { %3442 = vmatprep.mubr.msk.f32.mxu1 %vm3903_vm1, %v3902_v16 }
 0x138   :  { %v3423_v17 = vpop.f32.mrb[0].mxu1 }
 0x139   :  { %v201_v18 = vpop.f32.mrb[1].mxu1  ;;  %v4102_v25 = vadd.f32 %v3423_v17, %v3264_v21 }
 0x13a   :  { %v4107_v26 = vadd.f32 %v3264_v21, %v201_v18 }
 0x140   :  { %v3434_v20 = vpop.f32.mrb[2].mxu1 }
 0x141   :  { %v4094_v22 = vadd.f32 %v3434_v20, %v3267_v19  ;;  %v293_v23 = vpop.f32.mrb[3].mxu1 }
 0x142   :  { %v4096_v24 = vadd.f32 %v3267_v19, %v293_v23 }
 0x143   :  { %569 = vrot.lane.b32.xlu1 %v4094_v22, %s3904_s24  ;;  %3441 = vmatpush3.xpose.msk.msra.mxu1 %vm318_vm2, %v4094_v22 }
 0x144   :  { %3436 = vmatpush3.xpose.msk.msra.mxu0 %vm318_vm2, %v4096_v24  ;;  %3450 = vmatprep.subr.mxu1 %v3902_v16 }
 0x145   :  { %3445 = vmatprep.subr.mxu0 %v3902_v16 }
 0x146   :  { %3443 = vmatmul.mubr.msk.f32.vlgmr.msra.gmra.mrb[4].mxu1 %vm318_vm2, %v4102_v25 }
 0x147   :  { %649 = vrot.lane.b32.xlu1 %v4096_v24, %s3905_s5  ;;  %3438 = vmatmul.mubr.msk.f32.vlgmr.msra.gmra.mrb[0].mxu0 %vm318_vm2, %v4107_v26 }
 0x148   :  { %3452 = vmatprep.mubr.msk.f32.mxu1 %vm3903_vm1, %v3902_v16  ;;  %3447 = vmatprep.mubr.msk.f32.mxu0 %vm3903_vm1, %v3902_v16 }
 0x14b   :  { %727 = vrot.lane.b32.xlu1 %v4094_v22, %s3905_s5 }
 0x1b5   :  { %v570_v27 = vpop.permute.xlu1 %569 }
 0x1b6   :  { %3451 = vmatpush3.msra.mxu1 %v570_v27 }
 0x1b7   :  { %3460 = vmatprep.subr.mxu1 %v3902_v16 }
 0x1b9   :  { %v650_v49 = vpop.permute.xlu1 %649 }
 0x1bd   :  { %v728_v50 = vpop.permute.xlu1 %727 }
 0x219   :  { %v467_v29 = vpop.f32.mrb[4].mxu1 }
 0x21a   :  { %v391_v31 = vpop.f32.mrb[0].mxu0  ;;  %v3444_v32 = vpop.f32.mrb[5].mxu1  ;;  %v468_v35 = vadd.f32 %v4131_v30, %v467_v29 }
 0x21b   :  { %v392_v33 = vadd.f32 %v4126_v28, %v391_v31  ;;  %v3439_v34 = vpop.f32.mrb[1].mxu0 }
 0x21c   :  { %v474_v37 = vsel %vm318_vm2, %v468_v35, -inf }
 0x21d   :  { %v471_v36 = vsel %vm318_vm2, %v392_v33, -inf }
 0x21e   :  { %472 = vmax.xlane.f32.xlu0 %v471_v36 }
 0x222   :  { %475 = vmax.xlane.f32.xlu0 %v474_v37 }
 0x238   :  { %493 = vrot.lane.b32.xlu0 %v4096_v24, %s3904_s24 }
 0x23c   :  { %647 = vrot.lane.b32.xlu0 %v4107_v26, %s3905_s5 }
 0x2ab   :  { %v473_v38 = vpop.xlane.xlu0 %472 }
 0x2ac   :  { %v477_v39 = vsub.f32 %v392_v33, %v473_v38 }
 0x2ae   :  { %v479_v42 = vmul.f32 1.442695, %v477_v39 }
 0x2af   :  { %v476_v40 = vpop.xlane.xlu0 %475 }
 0x2b0   :  { %v478_v41 = vsub.f32 %v468_v35, %v476_v40 }
 0x2b2   :  { %v481_v43 = vmul.f32 1.442695, %v478_v41 }
 0x2b3   :  { %v494_v44 = vpop.permute.xlu0 %493 }
 0x2b4   :  { %3657 = vpow2.f32 %v481_v43  ;;  %3446 = vmatpush3.msra.mxu0 %v494_v44 }
 0x2b5   :  { %3455 = vmatprep.subr.mxu0 %v3902_v16  ;;  %3659 = vpow2.f32 %v479_v42 }
 0x2b7   :  { %v648_v58 = vpop.permute.xlu0 %647 }
 0x2be   :  { %v3658_v45 = vpop.eup %3657 }
 0x2bf   :  { %v486_v46 = vsel %vm318_vm2, %v3658_v45, 0.0  ;;  %v3660_v47 = vpop.eup %3659 }
 0x2c0   :  { %487 = vadd.xlane.f32.xlu1 %v486_v46  ;;  %v483_v48 = vsel %vm318_vm2, %v3660_v47, 0.0 }
 0x2c4   :  { %484 = vadd.xlane.f32.xlu1 %v483_v48 }
 0x2d5   :  { %725 = vrot.lane.b32.xlu1 %v4102_v25, %s3905_s5 }
 0x34d   :  { %v488_v51 = vpop.xlane.xlu1 %487 }
 0x34e   :  { %3661 = vrcp.f32 %v488_v51 }
 0x351   :  { %v485_v52 = vpop.xlane.xlu1 %484 }
 0x352   :  { %3663 = vrcp.f32 %v485_v52 }
 0x355   :  { %v726_v57 = vpop.permute.xlu1 %725 }
 0x358   :  { %v3662_v53 = vpop.eup %3661 }
 0x359   :  { %v492_v54 = vmul.f32 %v3662_v53, %v3658_v45 }
 0x35b   :  { %3453 = vmatmul.mubr.msk.f32.vlgmr.msra.gmra.mrb[6].mxu1 %vm318_vm2, %v492_v54 }
 0x35c   :  { %v3664_v55 = vpop.eup %3663  ;;  %3461 = vmatpush3.xpose.msk.msra.mxu1 %vm318_vm2, %v728_v50  ;;  %3462 = vmatprep.mubr.msk.f32.mxu1 %vm3903_vm1, %v3902_v16 }
 0x35d   :  { %v491_v56 = vmul.f32 %v3664_v55, %v3660_v47  ;;  %3470 = vmatprep.subr.mxu1 %v3902_v16 }
 0x35f   :  { %3448 = vmatmul.mubr.msk.f32.vlgmr.msra.gmra.mrb[2].mxu0 %vm318_vm2, %v491_v56  ;;  %3463 = vmatmul.mubr.msk.f32.vlgmr.msra.gmra.mrb[8].mxu1 %vm318_vm2, %v726_v57 }
 0x360   :  { %3456 = vmatpush3.xpose.msk.msra.mxu0 %vm318_vm2, %v650_v49  ;;  %3457 = vmatprep.mubr.msk.f32.mxu0 %vm3903_vm1, %v3902_v16 }
 0x361   :  { %3465 = vmatprep.subr.mxu0 %v3902_v16  ;;  %3472 = vmatprep.mubr.msk.f32.mxu1 %vm3903_vm1, %v3902_v16 }
 0x363   :  { %3458 = vmatmul.mubr.msk.f32.vlgmr.msra.gmra.mrb[4].mxu0 %vm318_vm2, %v648_v58 }
 0x364   :  { %3467 = vmatprep.mubr.msk.f32.mxu0 %vm3903_vm1, %v3902_v16 }
 0x42e   :  { %v641_v59 = vpop.f32.mrb[6].mxu1 }
 0x42f   :  { %646 = vst.msk [vmem:[#allocation2 + $0x8] sm:$0xff] %vm318_vm2, %v641_v59  ;;  %v3454_v60 = vpop.f32.mrb[7].mxu1 }
 0x432   :  { %v565_v61 = vpop.f32.mrb[2].mxu0  ;;  %v799_v62 = vpop.f32.mrb[8].mxu1 }
 0x433   :  { %645 = vst.msk [vmem:[#allocation2] sm:$0xff] %vm318_vm2, %v565_v61  ;;  %v800_v63 = vadd.f32 %v4131_v30, %v799_v62  ;;  %v3449_v0 = vpop.f32.mrb[3].mxu0  ;;  %v3464_v1 = vpop.f32.mrb[9].mxu1 }
 0x435   :  { %v806_v2 = vsel %vm318_vm2, %v800_v63, -inf }
 0x436   :  { %807 = vmax.xlane.f32.xlu1 %v806_v2  ;;  %v721_v3 = vpop.f32.mrb[4].mxu0 }
 0x437   :  { %v722_v4 = vadd.f32 %v4126_v28, %v721_v3  ;;  %v3459_v5 = vpop.f32.mrb[5].mxu0 }
 0x439   :  { %v803_v6 = vsel %vm318_vm2, %v722_v4, -inf }
 0x43a   :  { %804 = vmax.xlane.f32.xlu0 %v803_v6 }
 0x447   :  { %901 = vrot.lane.b32.xlu1 %v4094_v22, %s3906_s2 }
 0x44b   :  { %990 = vrot.lane.b32.xlu1 %v4096_v24, %s3907_s27 }
 0x44f   :  { %1068 = vrot.lane.b32.xlu1 %v4094_v22, %s3907_s27 }
 0x450   :  { %825 = vrot.lane.b32.xlu0 %v4096_v24, %s3906_s2 }
 0x453   :  { %1066 = vrot.lane.b32.xlu1 %v4102_v25, %s3907_s27 }
 0x4c3   :  { %v808_v7 = vpop.xlane.xlu1 %807 }
 0x4c4   :  { %v810_v8 = vsub.f32 %v800_v63, %v808_v7 }
 0x4c6   :  { %v813_v9 = vmul.f32 1.442695, %v810_v8 }
 0x4c7   :  { %v902_v10 = vpop.permute.xlu1 %901  ;;  %v805_v11 = vpop.xlane.xlu0 %804 }
 0x4c8   :  { %3665 = vpow2.f32 %v813_v9  ;;  %v809_v12 = vsub.f32 %v722_v4, %v805_v11  ;;  %3471 = vmatpush3.msra.mxu1 %v902_v10 }
 0x4c9   :  { %3480 = vmatprep.subr.mxu1 %v3902_v16 }
 0x4ca   :  { %v811_v13 = vmul.f32 1.442695, %v809_v12 }
 0x4cb   :  { %v826_v14 = vpop.permute.xlu0 %825  ;;  %v991_v23 = vpop.permute.xlu1 %990 }
 0x4cc   :  { %3667 = vpow2.f32 %v811_v13  ;;  %3466 = vmatpush3.msra.mxu0 %v826_v14 }
 0x4cd   :  { %3475 = vmatprep.subr.mxu0 %v3902_v16 }
 0x4cf   :  { %v1069_v29 = vpop.permute.xlu1 %1068 }
 0x4d2   :  { %v3666_v15 = vpop.eup %3665 }
 0x4d3   :  { %v818_v17 = vsel %vm318_vm2, %v3666_v15, 0.0  ;;  %v1067_v34 = vpop.permute.xlu1 %1066 }
 0x4d4   :  { %819 = vadd.xlane.f32.xlu0 %v818_v17 }
 0x4d6   :  { %v3668_v18 = vpop.eup %3667 }
 0x4d7   :  { %v815_v19 = vsel %vm318_vm2, %v3668_v18, 0.0 }
 0x4d8   :  { %816 = vadd.xlane.f32.xlu0 %v815_v19 }
 0x4ee   :  { %988 = vrot.lane.b32.xlu0 %v4107_v26, %s3907_s27 }
 0x561   :  { %v820_v20 = vpop.xlane.xlu0 %819 }
 0x562   :  { %3669 = vrcp.f32 %v820_v20 }
 0x565   :  { %v817_v21 = vpop.xlane.xlu0 %816 }
 0x566   :  { %3671 = vrcp.f32 %v817_v21 }
 0x569   :  { %v989_v35 = vpop.permute.xlu0 %988 }
 0x56c   :  { %v3670_v27 = vpop.eup %3669 }
 0x56d   :  { %v824_v31 = vmul.f32 %v3670_v27, %v3666_v15 }
 0x56f   :  { %3473 = vmatmul.mubr.msk.f32.vlgmr.msra.gmra.mrb[10].mxu1 %vm318_vm2, %v824_v31 }
 0x570   :  { %v3672_v32 = vpop.eup %3671  ;;  %3481 = vmatpush3.xpose.msk.msra.mxu1 %vm318_vm2, %v1069_v29  ;;  %3482 = vmatprep.mubr.msk.f32.mxu1 %vm3903_vm1, %v3902_v16 }
 0x571   :  { %v823_v33 = vmul.f32 %v3672_v32, %v3668_v18  ;;  %3490 = vmatprep.subr.mxu1 %v3902_v16 }
 0x573   :  { %3468 = vmatmul.mubr.msk.f32.vlgmr.msra.gmra.mrb[6].mxu0 %vm318_vm2, %v823_v33  ;;  %3483 = vmatmul.mubr.msk.f32.vlgmr.msra.gmra.mrb[12].mxu1 %vm318_vm2, %v1067_v34 }
 0x574   :  { %3476 = vmatpush3.xpose.msk.msra.mxu0 %vm318_vm2, %v991_v23  ;;  %3477 = vmatprep.mubr.msk.f32.mxu0 %vm3903_vm1, %v3902_v16 }
 0x575   :  { %3485 = vmatprep.subr.mxu0 %v3902_v16  ;;  %3492 = vmatprep.mubr.msk.f32.mxu1 %vm3903_vm1, %v3902_v16 }
 0x577   :  { %3478 = vmatmul.mubr.msk.f32.vlgmr.msra.gmra.mrb[8].mxu0 %vm318_vm2, %v989_v35 }
 0x578   :  { %3487 = vmatprep.mubr.msk.f32.mxu0 %vm3903_vm1, %v3902_v16 }
 0x642   :  { %v4196_v36 = vpop.f32.mrb[10].mxu1 }
 0x643   :  { %v3474_v37 = vpop.f32.mrb[11].mxu1 }
 0x646   :  { %v4198_v38 = vpop.f32.mrb[6].mxu0  ;;  %v1140_v39 = vpop.f32.mrb[12].mxu1 }
 0x647   :  { %v1141_v40 = vadd.f32 %v4131_v30, %v1140_v39  ;;  %v3469_v41 = vpop.f32.mrb[7].mxu0  ;;  %v3484_v42 = vpop.f32.mrb[13].mxu1 }
 0x649   :  { %v1147_v43 = vsel %vm318_vm2, %v1141_v40, -inf }
 0x64a   :  { %1148 = vmax.xlane.f32.xlu1 %v1147_v43  ;;  %v1062_v44 = vpop.f32.mrb[8].mxu0 }
 0x64b   :  { %v1063_v45 = vadd.f32 %v4126_v28, %v1062_v44  ;;  %v3479_v46 = vpop.f32.mrb[9].mxu0 }
 0x64d   :  { %v1144_v47 = vsel %vm318_vm2, %v1063_v45, -inf }
 0x64e   :  { %1145 = vmax.xlane.f32.xlu0 %v1144_v47 }
 0x65b   :  { %1242 = vrot.lane.b32.xlu1 %v4094_v22, %s3908_s29 }
 0x65f   :  { %1331 = vrot.lane.b32.xlu1 %v4096_v24, %s3909_s30 }
 0x663   :  { %1409 = vrot.lane.b32.xlu1 %v4094_v22, %s3909_s30 }
 0x664   :  { %1166 = vrot.lane.b32.xlu0 %v4096_v24, %s3908_s29 }
 0x667   :  { %1407 = vrot.lane.b32.xlu1 %v4102_v25, %s3909_s30 }
 0x6d7   :  { %v1149_v48 = vpop.xlane.xlu1 %1148 }
 0x6d8   :  { %v1151_v49 = vsub.f32 %v1141_v40, %v1149_v48 }
 0x6da   :  { %v1154_v50 = vmul.f32 1.442695, %v1151_v49  ;;  %v4277_v49 = vld [vmem:[%s4514_s3 + $0x1] ss:$0 sm:$0xff] }
 0x6db   :  { %v1243_v51 = vpop.permute.xlu1 %1242  ;;  %v1146_v52 = vpop.xlane.xlu0 %1145 }
 0x6dc   :  { %3673 = vpow2.f32 %v1154_v50  ;;  %v1150_v53 = vsub.f32 %v1063_v45, %v1146_v52  ;;  %3491 = vmatpush3.msra.mxu1 %v1243_v51 }
 0x6dd   :  { %3500 = vmatprep.subr.mxu1 %v3902_v16 }
 0x6de   :  { %v1152_v54 = vmul.f32 1.442695, %v1150_v53 }
 0x6df   :  { %v1167_v55 = vpop.permute.xlu0 %1166  ;;  %v1332_v62 = vpop.permute.xlu1 %1331 }
 0x6e0   :  { %3675 = vpow2.f32 %v1152_v54  ;;  %3486 = vmatpush3.msra.mxu0 %v1167_v55  ;;  %v4285_v55 = vld [vmem:[%s4514_s3] ss:$0 sm:$0xff]  ;;  %s3912_s3 = smov 56  }
 0x6e1   :  { %3495 = vmatprep.subr.mxu0 %v3902_v16 }
 0x6e3   :  { %v1410_v0 = vpop.permute.xlu1 %1409 }
 0x6e6   :  { %v3674_v56 = vpop.eup %3673 }
 0x6e7   :  { %v1159_v57 = vsel %vm318_vm2, %v3674_v56, 0.0  ;;  %v1408_v4 = vpop.permute.xlu1 %1407 }
 0x6e8   :  { %1160 = vadd.xlane.f32.xlu0 %v1159_v57 }
 0x6ea   :  { %v3676_v58 = vpop.eup %3675 }
 0x6eb   :  { %v1156_v59 = vsel %vm318_vm2, %v3676_v58, 0.0 }
 0x6ec   :  { %1157 = vadd.xlane.f32.xlu0 %v1156_v59 }
 0x702   :  { %1329 = vrot.lane.b32.xlu0 %v4107_v26, %s3909_s30 }
 0x775   :  { %v1161_v60 = vpop.xlane.xlu0 %1160 }
 0x776   :  { %3677 = vrcp.f32 %v1161_v60 }
 0x779   :  { %v1158_v61 = vpop.xlane.xlu0 %1157 }
 0x77a   :  { %3679 = vrcp.f32 %v1158_v61 }
 0x77d   :  { %v1330_v5 = vpop.permute.xlu0 %1329 }
 0x780   :  { %v3678_v63 = vpop.eup %3677 }
 0x781   :  { %v1165_v1 = vmul.f32 %v3678_v63, %v3674_v56 }
 0x783   :  { %3493 = vmatmul.mubr.msk.f32.vlgmr.msra.gmra.mrb[14].mxu1 %vm318_vm2, %v1165_v1 }
 0x784   :  { %v3680_v2 = vpop.eup %3679  ;;  %3501 = vmatpush3.xpose.msk.msra.mxu1 %vm318_vm2, %v1410_v0  ;;  %3502 = vmatprep.mubr.msk.f32.mxu1 %vm3903_vm1, %v3902_v16 }
 0x785   :  { %v1164_v3 = vmul.f32 %v3680_v2, %v3676_v58  ;;  %3510 = vmatprep.subr.mxu1 %v3902_v16 }
 0x787   :  { %3488 = vmatmul.mubr.msk.f32.vlgmr.msra.gmra.mrb[10].mxu0 %vm318_vm2, %v1164_v3  ;;  %3503 = vmatmul.mubr.msk.f32.vlgmr.msra.gmra.mrb[16].mxu1 %vm318_vm2, %v1408_v4 }
 0x788   :  { %3496 = vmatpush3.xpose.msk.msra.mxu0 %vm318_vm2, %v1332_v62  ;;  %3497 = vmatprep.mubr.msk.f32.mxu0 %vm3903_vm1, %v3902_v16 }
 0x789   :  { %3505 = vmatprep.subr.mxu0 %v3902_v16  ;;  %3512 = vmatprep.mubr.msk.f32.mxu1 %vm3903_vm1, %v3902_v16 }
 0x78b   :  { %3498 = vmatmul.mubr.msk.f32.vlgmr.msra.gmra.mrb[12].mxu0 %vm318_vm2, %v1330_v5 }
 0x78c   :  { %3507 = vmatprep.mubr.msk.f32.mxu0 %vm3903_vm1, %v3902_v16 }
 0x856   :  { %v4232_v6 = vpop.f32.mrb[14].mxu1 }
 0x857   :  { %v3494_v7 = vpop.f32.mrb[15].mxu1 }
 0x85a   :  { %v4234_v8 = vpop.f32.mrb[10].mxu0  ;;  %v1481_v9 = vpop.f32.mrb[16].mxu1 }
 0x85b   :  { %v1482_v10 = vadd.f32 %v4131_v30, %v1481_v9  ;;  %v3489_v11 = vpop.f32.mrb[11].mxu0  ;;  %v3504_v12 = vpop.f32.mrb[17].mxu1 }
 0x85d   :  { %v1488_v13 = vsel %vm318_vm2, %v1482_v10, -inf }
 0x85e   :  { %1489 = vmax.xlane.f32.xlu1 %v1488_v13  ;;  %v1403_v14 = vpop.f32.mrb[12].mxu0 }
 0x85f   :  { %v1404_v15 = vadd.f32 %v4126_v28, %v1403_v14  ;;  %v3499_v17 = vpop.f32.mrb[13].mxu0 }
 0x861   :  { %v1485_v18 = vsel %vm318_vm2, %v1404_v15, -inf }
 0x862   :  { %1486 = vmax.xlane.f32.xlu0 %v1485_v18 }
 0x86f   :  { %1583 = vrot.lane.b32.xlu1 %v4094_v22, %s3910_s14 }
 0x873   :  { %1684 = vrot.lane.b32.xlu1 %v4107_v26, %s3904_s24 }
 0x877   :  { %1762 = vrot.lane.b32.xlu1 %v4102_v25, %s3904_s24 }
 0x878   :  { %1507 = vrot.lane.b32.xlu0 %v4096_v24, %s3910_s14 }
 0x87b   :  { %1760 = vrot.lane.b32.xlu1 %v4094_v22, %s3911_s6 }
 0x8eb   :  { %v1490_v28 = vpop.xlane.xlu1 %1489 }
 0x8ec   :  { %v1492_v30 = vsub.f32 %v1482_v10, %v1490_v28 }
 0x8ee   :  { %v1495_v19 = vmul.f32 1.442695, %v1492_v30 }
 0x8ef   :  { %v1584_v20 = vpop.permute.xlu1 %1583  ;;  %v1487_v21 = vpop.xlane.xlu0 %1486 }
 0x8f0   :  { %3681 = vpow2.f32 %v1495_v19  ;;  %v1491_v23 = vsub.f32 %v1404_v15, %v1487_v21  ;;  %3511 = vmatpush3.msra.mxu1 %v1584_v20 }
 0x8f1   :  { %3520 = vmatprep.subr.mxu1 %v3902_v16 }
 0x8f2   :  { %v1493_v27 = vmul.f32 1.442695, %v1491_v23 }
 0x8f3   :  { %v1508_v29 = vpop.permute.xlu0 %1507  ;;  %v1685_v39 = vpop.permute.xlu1 %1684 }
 0x8f4   :  { %3683 = vpow2.f32 %v1493_v27  ;;  %3506 = vmatpush3.msra.mxu0 %v1508_v29 }
 0x8f5   :  { %3515 = vmatprep.subr.mxu0 %v3902_v16 }
 0x8f7   :  { %v1763_v41 = vpop.permute.xlu1 %1762 }
 0x8fa   :  { %v3682_v31 = vpop.eup %3681 }
 0x8fb   :  { %v1500_v32 = vsel %vm318_vm2, %v3682_v31, 0.0  ;;  %v1761_v45 = vpop.permute.xlu1 %1760 }
 0x8fc   :  { %1501 = vadd.xlane.f32.xlu0 %v1500_v32 }
 0x8fe   :  { %v3684_v33 = vpop.eup %3683 }
 0x8ff   :  { %v1497_v34 = vsel %vm318_vm2, %v3684_v33, 0.0 }
 0x900   :  { %1498 = vadd.xlane.f32.xlu0 %v1497_v34 }
 0x916   :  { %1682 = vrot.lane.b32.xlu0 %v4096_v24, %s3911_s6 }
 0x989   :  { %v1502_v35 = vpop.xlane.xlu0 %1501 }
 0x98a   :  { %3685 = vrcp.f32 %v1502_v35 }
 0x98d   :  { %v1499_v37 = vpop.xlane.xlu0 %1498 }
 0x98e   :  { %3687 = vrcp.f32 %v1499_v37 }
 0x991   :  { %v1683_v46 = vpop.permute.xlu0 %1682 }
 0x994   :  { %v3686_v40 = vpop.eup %3685 }
 0x995   :  { %v1506_v42 = vmul.f32 %v3686_v40, %v3682_v31 }
 0x997   :  { %3513 = vmatmul.mubr.msk.f32.vlgmr.msra.gmra.mrb[18].mxu1 %vm318_vm2, %v1506_v42 }
 0x998   :  { %v3688_v43 = vpop.eup %3687  ;;  %3521 = vmatpush3.xpose.msk.msra.mxu1 %vm318_vm2, %v1763_v41  ;;  %3522 = vmatprep.mubr.msk.f32.mxu1 %vm3903_vm1, %v3902_v16 }
 0x999   :  { %v1505_v44 = vmul.f32 %v3688_v43, %v3684_v33  ;;  %3530 = vmatprep.subr.mxu1 %v3902_v16 }
 0x99b   :  { %3508 = vmatmul.mubr.msk.f32.vlgmr.msra.gmra.mrb[14].mxu0 %vm318_vm2, %v1505_v44  ;;  %3523 = vmatmul.mubr.msk.f32.vlgmr.msra.gmra.mrb[20].mxu1 %vm318_vm2, %v1761_v45 }
 0x99c   :  { %3516 = vmatpush3.xpose.msk.msra.mxu0 %vm318_vm2, %v1685_v39  ;;  %3517 = vmatprep.mubr.msk.f32.mxu0 %vm3903_vm1, %v3902_v16 }
 0x99d   :  { %3525 = vmatprep.subr.mxu0 %v3902_v16  ;;  %3532 = vmatprep.mubr.msk.f32.mxu1 %vm3903_vm1, %v3902_v16 }
 0x99f   :  { %3518 = vmatmul.mubr.msk.f32.vlgmr.msra.gmra.mrb[16].mxu0 %vm318_vm2, %v1683_v46 }
 0x9a0   :  { %3527 = vmatprep.mubr.msk.f32.mxu0 %vm3903_vm1, %v3902_v16 }
 0xa6a   :  { %v4272_v47 = vpop.f32.mrb[18].mxu1 }
 0xa6b   :  { %v3514_v48 = vpop.f32.mrb[19].mxu1 }
 0xa6e   :  { %v4279_v50 = vpop.f32.mrb[14].mxu0  ;;  %v1834_v51 = vpop.f32.mrb[20].mxu1 }
 0xa6f   :  { %v1835_v52 = vadd.f32 %v4277_v49, %v1834_v51  ;;  %v3509_v53 = vpop.f32.mrb[15].mxu0  ;;  %v3524_v54 = vpop.f32.mrb[21].mxu1 }
 0xa71   :  { %v1841_v56 = vsel %vm318_vm2, %v1835_v52, -inf }
 0xa72   :  { %1842 = vmax.xlane.f32.xlu1 %v1841_v56  ;;  %v1756_v57 = vpop.f32.mrb[16].mxu0 }
 0xa73   :  { %v1757_v58 = vadd.f32 %v4285_v55, %v1756_v57  ;;  %v3519_v59 = vpop.f32.mrb[17].mxu0 }
 0xa75   :  { %v1838_v60 = vsel %vm318_vm2, %v1757_v58, -inf }
 0xa76   :  { %1839 = vmax.xlane.f32.xlu0 %v1838_v60 }
 0xa83   :  { %1936 = vrot.lane.b32.xlu1 %v4102_v25, %s3911_s6 }
 0xa87   :  { %2016 = vrot.lane.b32.xlu1 %v4107_v26, %s3906_s2 }
 0xa8b   :  { %2094 = vrot.lane.b32.xlu1 %v4102_v25, %s3906_s2 }
 0xa8c   :  { %1860 = vrot.lane.b32.xlu0 %v4107_v26, %s3911_s6 }
 0xa8f   :  { %2092 = vrot.lane.b32.xlu1 %v4094_v22, %s3912_s3 }
 0xaff   :  { %v1843_v61 = vpop.xlane.xlu1 %1842 }
 0xb00   :  { %v1845_v62 = vsub.f32 %v1835_v52, %v1843_v61 }
 0xb02   :  { %v1848_v63 = vmul.f32 1.442695, %v1845_v62 }
 0xb03   :  { %v1937_v0 = vpop.permute.xlu1 %1936  ;;  %v1840_v1 = vpop.xlane.xlu0 %1839 }
 0xb04   :  { %3689 = vpow2.f32 %v1848_v63  ;;  %v1844_v2 = vsub.f32 %v1757_v58, %v1840_v1  ;;  %3531 = vmatpush3.msra.mxu1 %v1937_v0 }
 0xb05   :  { %3540 = vmatprep.subr.mxu1 %v3902_v16 }
 0xb06   :  { %v1846_v3 = vmul.f32 1.442695, %v1844_v2 }
 0xb07   :  { %v1861_v4 = vpop.permute.xlu0 %1860  ;;  %v2017_v13 = vpop.permute.xlu1 %2016 }
 0xb08   :  { %3691 = vpow2.f32 %v1846_v3  ;;  %3526 = vmatpush3.msra.mxu0 %v1861_v4 }
 0xb09   :  { %3535 = vmatprep.subr.mxu0 %v3902_v16 }
 0xb0b   :  { %v2095_v15 = vpop.permute.xlu1 %2094 }
 0xb0e   :  { %v3690_v5 = vpop.eup %3689 }
 0xb0f   :  { %v1853_v7 = vsel %vm318_vm2, %v3690_v5, 0.0  ;;  %v2093_v30 = vpop.permute.xlu1 %2092 }
 0xb10   :  { %1854 = vadd.xlane.f32.xlu0 %v1853_v7 }
 0xb12   :  { %v3692_v9 = vpop.eup %3691 }
 0xb13   :  { %v1850_v10 = vsel %vm318_vm2, %v3692_v9, 0.0 }
 0xb14   :  { %1851 = vadd.xlane.f32.xlu0 %v1850_v10 }
 0xb2a   :  { %2014 = vrot.lane.b32.xlu0 %v4096_v24, %s3912_s3 }
 0xb9d   :  { %v1855_v11 = vpop.xlane.xlu0 %1854 }
 0xb9e   :  { %3693 = vrcp.f32 %v1855_v11 }
 0xba1   :  { %v1852_v12 = vpop.xlane.xlu0 %1851 }
 0xba2   :  { %3695 = vrcp.f32 %v1852_v12 }
 0xba5   :  { %v2015_v19 = vpop.permute.xlu0 %2014 }
 0xba8   :  { %v3694_v14 = vpop.eup %3693 }
 0xba9   :  { %v1859_v17 = vmul.f32 %v3694_v14, %v3690_v5 }
 0xbab   :  { %3533 = vmatmul.mubr.msk.f32.vlgmr.msra.gmra.mrb[22].mxu1 %vm318_vm2, %v1859_v17 }
 0xbac   :  { %v3696_v18 = vpop.eup %3695  ;;  %3541 = vmatpush3.xpose.msk.msra.mxu1 %vm318_vm2, %v2095_v15  ;;  %3542 = vmatprep.mubr.msk.f32.mxu1 %vm3903_vm1, %v3902_v16 }
 0xbad   :  { %v1858_v28 = vmul.f32 %v3696_v18, %v3692_v9  ;;  %3550 = vmatprep.subr.mxu1 %v3902_v16 }
 0xbaf   :  { %3528 = vmatmul.mubr.msk.f32.vlgmr.msra.gmra.mrb[18].mxu0 %vm318_vm2, %v1858_v28  ;;  %3543 = vmatmul.mubr.msk.f32.vlgmr.msra.gmra.mrb[24].mxu1 %vm318_vm2, %v2093_v30 }
 0xbb0   :  { %3536 = vmatpush3.xpose.msk.msra.mxu0 %vm318_vm2, %v2017_v13  ;;  %3537 = vmatprep.mubr.msk.f32.mxu0 %vm3903_vm1, %v3902_v16 }
 0xbb1   :  { %3545 = vmatprep.subr.mxu0 %v3902_v16  ;;  %3552 = vmatprep.mubr.msk.f32.mxu1 %vm3903_vm1, %v3902_v16 }
 0xbb3   :  { %3538 = vmatmul.mubr.msk.f32.vlgmr.msra.gmra.mrb[20].mxu0 %vm318_vm2, %v2015_v19 }
 0xbb4   :  { %3547 = vmatprep.mubr.msk.f32.mxu0 %vm3903_vm1, %v3902_v16 }
 0xc7e   :  { %v2008_v20 = vpop.f32.mrb[22].mxu1 }
 0xc7f   :  { %2013 = vst.msk [vmem:[#allocation2 + $0x18] sm:$0xff] %vm318_vm2, %v2008_v20  ;;  %v3534_v21 = vpop.f32.mrb[23].mxu1 }
 0xc82   :  { %v1932_v23 = vpop.f32.mrb[18].mxu0  ;;  %v2166_v27 = vpop.f32.mrb[24].mxu1 }
 0xc83   :  { %2012 = vst.msk [vmem:[#allocation2 + $0x10] sm:$0xff] %vm318_vm2, %v1932_v23  ;;  %v2167_v29 = vadd.f32 %v4277_v49, %v2166_v27  ;;  %v3529_v31 = vpop.f32.mrb[19].mxu0  ;;  %v3544_v32 = vpop.f32.mrb[25].mxu1 }
 0xc85   :  { %v2173_v33 = vsel %vm318_vm2, %v2167_v29, -inf }
 0xc86   :  { %2174 = vmax.xlane.f32.xlu1 %v2173_v33  ;;  %v2088_v34 = vpop.f32.mrb[20].mxu0 }
 0xc87   :  { %v2089_v35 = vadd.f32 %v4285_v55, %v2088_v34  ;;  %v3539_v37 = vpop.f32.mrb[21].mxu0 }
 0xc89   :  { %v2170_v39 = vsel %vm318_vm2, %v2089_v35, -inf }
 0xc8a   :  { %2171 = vmax.xlane.f32.xlu0 %v2170_v39 }
 0xc97   :  { %2268 = vrot.lane.b32.xlu1 %v4102_v25, %s3912_s3 }
 0xc9b   :  { %2356 = vrot.lane.b32.xlu1 %v4107_v26, %s3908_s29 }
 0xc9f   :  { %2434 = vrot.lane.b32.xlu1 %v4102_v25, %s3908_s29 }
 0xca0   :  { %2192 = vrot.lane.b32.xlu0 %v4107_v26, %s3912_s3 }
 0xca3   :  { %2432 = vrot.lane.b32.xlu1 %v4094_v22, %s3913_s26 }
 0xd13   :  { %v2175_v40 = vpop.xlane.xlu1 %2174 }
 0xd14   :  { %v2177_v41 = vsub.f32 %v2167_v29, %v2175_v40 }
 0xd16   :  { %v2180_v42 = vmul.f32 1.442695, %v2177_v41 }
 0xd17   :  { %v2269_v43 = vpop.permute.xlu1 %2268  ;;  %v2172_v44 = vpop.xlane.xlu0 %2171 }
 0xd18   :  { %3697 = vpow2.f32 %v2180_v42  ;;  %v2176_v45 = vsub.f32 %v2089_v35, %v2172_v44  ;;  %3551 = vmatpush3.msra.mxu1 %v2269_v43 }
 0xd19   :  { %3560 = vmatprep.subr.mxu1 %v3902_v16 }
 0xd1a   :  { %v2178_v46 = vmul.f32 1.442695, %v2176_v45 }
 0xd1b   :  { %v2193_v48 = vpop.permute.xlu0 %2192  ;;  %v2357_v58 = vpop.permute.xlu1 %2356 }
 0xd1c   :  { %3699 = vpow2.f32 %v2178_v46  ;;  %3546 = vmatpush3.msra.mxu0 %v2193_v48 }
 0xd1d   :  { %3555 = vmatprep.subr.mxu0 %v3902_v16 }
 0xd1f   :  { %v2435_v60 = vpop.permute.xlu1 %2434 }
 0xd22   :  { %v3698_v51 = vpop.eup %3697 }
 0xd23   :  { %v2185_v52 = vsel %vm318_vm2, %v3698_v51, 0.0  ;;  %v2433_v0 = vpop.permute.xlu1 %2432 }
 0xd24   :  { %2186 = vadd.xlane.f32.xlu0 %v2185_v52 }
 0xd26   :  { %v3700_v53 = vpop.eup %3699 }
 0xd27   :  { %v2182_v54 = vsel %vm318_vm2, %v3700_v53, 0.0 }
 0xd28   :  { %2183 = vadd.xlane.f32.xlu0 %v2182_v54 }
 0xd3e   :  { %2354 = vrot.lane.b32.xlu0 %v4096_v24, %s3913_s26 }
 0xdb1   :  { %v2187_v56 = vpop.xlane.xlu0 %2186 }
 0xdb2   :  { %3701 = vrcp.f32 %v2187_v56 }
 0xdb5   :  { %v2184_v57 = vpop.xlane.xlu0 %2183 }
 0xdb6   :  { %3703 = vrcp.f32 %v2184_v57 }
 0xdb9   :  { %v2355_v1 = vpop.permute.xlu0 %2354 }
 0xdbc   :  { %v3702_v59 = vpop.eup %3701 }
 0xdbd   :  { %v2191_v61 = vmul.f32 %v3702_v59, %v3698_v51 }
 0xdbf   :  { %3553 = vmatmul.mubr.msk.f32.vlgmr.msra.gmra.mrb[26].mxu1 %vm318_vm2, %v2191_v61 }
 0xdc0   :  { %v3704_v62 = vpop.eup %3703  ;;  %3561 = vmatpush3.xpose.msk.msra.mxu1 %vm318_vm2, %v2435_v60  ;;  %3562 = vmatprep.mubr.msk.f32.mxu1 %vm3903_vm1, %v3902_v16 }
 0xdc1   :  { %v2190_v63 = vmul.f32 %v3704_v62, %v3700_v53  ;;  %3570 = vmatprep.subr.mxu1 %v3902_v16 }
 0xdc3   :  { %3548 = vmatmul.mubr.msk.f32.vlgmr.msra.gmra.mrb[22].mxu0 %vm318_vm2, %v2190_v63  ;;  %3563 = vmatmul.mubr.msk.f32.vlgmr.msra.gmra.mrb[28].mxu1 %vm318_vm2, %v2433_v0 }
 0xdc4   :  { %3556 = vmatpush3.xpose.msk.msra.mxu0 %vm318_vm2, %v2357_v58  ;;  %3557 = vmatprep.mubr.msk.f32.mxu0 %vm3903_vm1, %v3902_v16 }
 0xdc5   :  { %3565 = vmatprep.subr.mxu0 %v3902_v16  ;;  %3572 = vmatprep.mubr.msk.f32.mxu1 %vm3903_vm1, %v3902_v16 }
 0xdc7   :  { %3558 = vmatmul.mubr.msk.f32.vlgmr.msra.gmra.mrb[24].mxu0 %vm318_vm2, %v2355_v1 }
 0xdc8   :  { %3567 = vmatprep.mubr.msk.f32.mxu0 %vm3903_vm1, %v3902_v16 }
 0xe92   :  { %v4360_v2 = vpop.f32.mrb[26].mxu1 }
 0xe93   :  { %v3554_v3 = vpop.f32.mrb[27].mxu1 }
 0xe96   :  { %v4362_v4 = vpop.f32.mrb[22].mxu0  ;;  %v2506_v5 = vpop.f32.mrb[28].mxu1 }
 0xe97   :  { %v2507_v7 = vadd.f32 %v4277_v49, %v2506_v5  ;;  %v3549_v9 = vpop.f32.mrb[23].mxu0  ;;  %v3564_v10 = vpop.f32.mrb[29].mxu1 }
 0xe98   :  { %v3039_v9 = vld [vmem:[#allocation11 + $0x8] sm:$0xff] }
 0xe99   :  { %v2513_v11 = vsel %vm318_vm2, %v2507_v7, -inf }
 0xe9a   :  { %2514 = vmax.xlane.f32.xlu1 %v2513_v11  ;;  %v2428_v12 = vpop.f32.mrb[24].mxu0 }
 0xe9b   :  { %v2429_v13 = vadd.f32 %v4285_v55, %v2428_v12  ;;  %v3559_v14 = vpop.f32.mrb[25].mxu0 }
 0xe9c   :  { %v3041_v14 = vld [vmem:[#allocation11 + $0x18] sm:$0xff] }
 0xe9d   :  { %v2510_v15 = vsel %vm318_vm2, %v2429_v13, -inf }
 0xe9e   :  { %2511 = vmax.xlane.f32.xlu0 %v2510_v15 }
 0xeab   :  { %2608 = vrot.lane.b32.xlu1 %v4102_v25, %s3913_s26 }
 0xeaf   :  { %2696 = vrot.lane.b32.xlu1 %v4107_v26, %s3910_s14 }
 0xeb3   :  { %2774 = vrot.lane.b32.xlu1 %v4102_v25, %s3910_s14 }
 0xeb4   :  { %2532 = vrot.lane.b32.xlu0 %v4107_v26, %s3913_s26 }
 0xeb7   :  { %2772 = vrot.lane.b32.xlu1 %v4094_v22, %s3914_s4 }
 0xf27   :  { %v2515_v17 = vpop.xlane.xlu1 %2514 }
 0xf28   :  { %v2517_v18 = vsub.f32 %v2507_v7, %v2515_v17  ;;  %v3038_v7 = vld [vmem:[#allocation11] sm:$0xff] }
 0xf29   :  { %v3625_v11 = vpack.c.bf16 %v3039_v9, %v3038_v7 }
 0xf2a   :  { %v2520_v28 = vmul.f32 1.442695, %v2517_v18 }
 0xf2b   :  { %v2609_v30 = vpop.permute.xlu1 %2608  ;;  %v2512_v19 = vpop.xlane.xlu0 %2511 }
 0xf2c   :  { %3705 = vpow2.f32 %v2520_v28  ;;  %v2516_v20 = vsub.f32 %v2429_v13, %v2512_v19  ;;  %3571 = vmatpush3.msra.mxu1 %v2609_v30 }
 0xf2d   :  { %3580 = vmatprep.subr.mxu1 %v3902_v16 }
 0xf2e   :  { %v2518_v21 = vmul.f32 1.442695, %v2516_v20 }
 0xf2f   :  { %v2533_v23 = vpop.permute.xlu0 %2532  ;;  %v2697_v34 = vpop.permute.xlu1 %2696 }
 0xf30   :  { %3707 = vpow2.f32 %v2518_v21  ;;  %3566 = vmatpush3.msra.mxu0 %v2533_v23 }
 0xf31   :  { %3575 = vmatprep.subr.mxu0 %v3902_v16 }
 0xf33   :  { %v2775_v37 = vpop.permute.xlu1 %2774 }
 0xf36   :  { %v3706_v27 = vpop.eup %3705 }
 0xf37   :  { %v2525_v29 = vsel %vm318_vm2, %v3706_v27, 0.0 }
 0xf38   :  { %2526 = vadd.xlane.f32.xlu0 %v2525_v29 }
 0xf3a   :  { %v3708_v22 = vpop.eup %3707 }
 0xf3b   :  { %v2522_v31 = vsel %vm318_vm2, %v3708_v22, 0.0 }
 0xf3c   :  { %2523 = vadd.xlane.f32.xlu0 %v2522_v31 }
 0xf52   :  { %2694 = vrot.lane.b32.xlu0 %v4096_v24, %s3914_s4  ;;  %v2773_v24 = vpop.permute.xlu1 %2772 }
 0xfc5   :  { %v2527_v32 = vpop.xlane.xlu0 %2526 }
 0xfc6   :  { %3709 = vrcp.f32 %v2527_v32  ;;  %v3322_v32 = vld [vmem:[%s4520_s9] ss:$0 sm:$0xff] }
 0xfc9   :  { %v2524_v33 = vpop.xlane.xlu0 %2523 }
 0xfca   :  { %3711 = vrcp.f32 %v2524_v33 }
 0xfcd   :  { %v2695_v42 = vpop.permute.xlu0 %2694 }
 0xfd0   :  { %v3710_v35 = vpop.eup %3709 }
 0xfd1   :  { %v2531_v39 = vmul.f32 %v3710_v35, %v3706_v27  ;;  %v3729_v35 = vld [vmem:[#allocation3] sm:$0xff] }
 0xfd3   :  { %3573 = vmatmul.mubr.msk.f32.vlgmr.msra.gmra.mrb[30].mxu1 %vm318_vm2, %v2531_v39  ;;  %v3730_v39 = vld [vmem:[#allocation3 + $0x8] sm:$0xff] }
 0xfd4   :  { %v3712_v40 = vpop.eup %3711  ;;  %3581 = vmatpush3.xpose.msk.msra.mxu1 %vm318_vm2, %v2775_v37  ;;  %3582 = vmatprep.mubr.msk.f32.mxu1 %vm3903_vm1, %v3902_v16 }
 0xfd5   :  { %v2530_v41 = vmul.f32 %v3712_v40, %v3708_v22  ;;  %3590 = vmatprep.subr.mxu1 %v3902_v16 }
 0xfd7   :  { %3568 = vmatmul.mubr.msk.f32.vlgmr.msra.gmra.mrb[26].mxu0 %vm318_vm2, %v2530_v41  ;;  %3583 = vmatmul.mubr.msk.f32.vlgmr.msra.gmra.mrb[32].mxu1 %vm318_vm2, %v2773_v24 }
 0xfd8   :  { %3576 = vmatpush3.xpose.msk.msra.mxu0 %vm318_vm2, %v2697_v34  ;;  %3577 = vmatprep.mubr.msk.f32.mxu0 %vm3903_vm1, %v3902_v16 }
 0xfd9   :  { %3585 = vmatprep.subr.mxu0 %v3902_v16  ;;  %3592 = vmatprep.mubr.msk.f32.mxu1 %vm3903_vm1, %v3902_v16 }
 0xfdb   :  { %3578 = vmatmul.mubr.msk.f32.vlgmr.msra.gmra.mrb[28].mxu0 %vm318_vm2, %v2695_v42 }
 0xfdc   :  { %3587 = vmatprep.mubr.msk.f32.mxu0 %vm3903_vm1, %v3902_v16 }
0x10a6   :  { %v2680_v43 = vpop.f32.mrb[30].mxu1 }
0x10a7   :  { %v3574_v44 = vpop.f32.mrb[31].mxu1 }
0x10aa   :  { %v2604_v45 = vpop.f32.mrb[26].mxu0  ;;  %v2846_v46 = vpop.f32.mrb[32].mxu1 }
0x10ab   :  { %v2847_v48 = vadd.f32 %v4277_v49, %v2846_v46  ;;  %v3569_v51 = vpop.f32.mrb[27].mxu0  ;;  %v3584_v52 = vpop.f32.mrb[33].mxu1 }
0x10ad   :  { %v2853_v53 = vsel %vm318_vm2, %v2847_v48, -inf }
0x10ae   :  { %2854 = vmax.xlane.f32.xlu1 %v2853_v53  ;;  %v2768_v54 = vpop.f32.mrb[28].mxu0 }
0x10af   :  { %v2769_v56 = vadd.f32 %v4285_v55, %v2768_v54  ;;  %v3579_v57 = vpop.f32.mrb[29].mxu0 }
0x10b1   :  { %v2850_v58 = vsel %vm318_vm2, %v2769_v56, -inf }
0x10b2   :  { %2851 = vmax.xlane.f32.xlu0 %v2850_v58 }
0x10bf   :  { %2948 = vrot.lane.b32.xlu1 %v4102_v25, %s3914_s4 }
0x10c3   :  { %979 = vrot.lane.b32.xlu1 %v4198_v38, %s3898_s21 }
0x10c7   :  { %981 = vrot.lane.b32.xlu1 %v4196_v36, %s3898_s21 }
0x10cb   :  { %1322 = vrot.lane.b32.xlu1 %v4232_v6, %s3915_s22 }
0x10cf   :  { %1663 = vrot.lane.b32.xlu1 %v4272_v47, %s3916_s8 }
0x10d3   :  { %2348 = vrot.lane.b32.xlu1 %v4360_v2, %s3898_s21 }
0x10d7   :  { %2688 = vrot.lane.b32.xlu1 %v2680_v43, %s3915_s22 }
0x113b   :  { %v2855_v16 = vpop.xlane.xlu1 %2854 }
0x113c   :  { %v2857_v25 = vsub.f32 %v2847_v48, %v2855_v16 }
0x113e   :  { %v2860_v49 = vmul.f32 1.442695, %v2857_v25 }
0x113f   :  { %v2949_v38 = vpop.permute.xlu1 %2948  ;;  %v2852_v55 = vpop.xlane.xlu0 %2851 }
0x1140   :  { %3713 = vpow2.f32 %v2860_v49  ;;  %v2856_v36 = vsub.f32 %v2769_v56, %v2852_v55  ;;  %3591 = vmatpush3.msra.mxu1 %v2949_v38 }
0x1142   :  { %v2858_v59 = vmul.f32 1.442695, %v2856_v36 }
0x1143   :  { %v980_v6 = vpop.permute.xlu1 %979 }
0x1144   :  { %3715 = vpow2.f32 %v2858_v59  ;;  %986 = vst.msk [vmem:[#allocation2] sm:$0xff] %vm985_vm3, %v980_v6  ;;  %v4457_v59 = vld [vmem:[%s4521_s10] ss:$0 sm:$0xff]  ;;  %s3917_s10 = smov [#allocation12]  }
0x1147   :  { %v982_v47 = vpop.permute.xlu1 %981 }
0x1148   :  { %987 = vst.msk [vmem:[#allocation2 + $0x8] sm:$0xff] %vm985_vm3, %v982_v47 }
0x114a   :  { %v3714_v60 = vpop.eup %3713 }
0x114b   :  { %v1323_v61 = vpop.permute.xlu1 %1322  ;;  %v2865_v62 = vsel %vm318_vm2, %v3714_v60, 0.0 }
0x114c   :  { %1328 = vst.msk [vmem:[#allocation2 + $0x8] sm:$0xff] %vm1326_vm4, %v1323_v61  ;;  %2866 = vadd.xlane.f32.xlu0 %v2865_v62 }
0x114e   :  { %v3716_v63 = vpop.eup %3715 }
0x114f   :  { %v1664_v0 = vpop.permute.xlu1 %1663  ;;  %v2862_v1 = vsel %vm318_vm2, %v3716_v63, 0.0 }
0x1150   :  { %1669 = vst.msk [vmem:[#allocation2 + $0x8] sm:$0xff] %vm1667_vm5, %v1664_v0  ;;  %2863 = vadd.xlane.f32.xlu0 %v2862_v1 }
0x1153   :  { %v2349_v2 = vpop.permute.xlu1 %2348 }
0x1154   :  { %2353 = vst.msk [vmem:[#allocation2 + $0x18] sm:$0xff] %vm985_vm3, %v2349_v2 }
0x1157   :  { %v2689_v3 = vpop.permute.xlu1 %2688  ;;  %v3035_v20 = vld [vmem:[#allocation2 + $0x8] sm:$0xff] }
0x1158   :  { %2693 = vst.msk [vmem:[#allocation2 + $0x18] sm:$0xff] %vm1326_vm4, %v2689_v3 }
0x1166   :  { %2872 = vrot.lane.b32.xlu0 %v4107_v26, %s3914_s4 }
0x116a   :  { %1320 = vrot.lane.b32.xlu0 %v4234_v8, %s3915_s22 }
0x116e   :  { %1661 = vrot.lane.b32.xlu0 %v4279_v50, %s3916_s8  ;;  %v3040_v50 = vld [vmem:[#allocation11 + $0x10] sm:$0xff] }
0x116f   :  { %v3629_v18 = vpack.c.bf16 %v3041_v14, %v3040_v50 }
0x1172   :  { %2346 = vrot.lane.b32.xlu0 %v4362_v4, %s3898_s21 }
0x1176   :  { %2686 = vrot.lane.b32.xlu0 %v2604_v45, %s3915_s22 }
0x11d9   :  { %v2867_v5 = vpop.xlane.xlu0 %2866 }
0x11da   :  { %3717 = vrcp.f32 %v2867_v5 }
0x11dd   :  { %v2864_v10 = vpop.xlane.xlu0 %2863 }
0x11de   :  { %3719 = vrcp.f32 %v2864_v10 }
0x11e1   :  { %v2873_v12 = vpop.permute.xlu0 %2872 }
0x11e2   :  { %3586 = vmatpush3.msra.mxu0 %v2873_v12 }
0x11e3   :  { %3626 = vmatprep.subr.bf16.mxu0 %v3625_v11 }
0x11e4   :  { %v3718_v26 = vpop.eup %3717 }
0x11e5   :  { %v2871_v8 = vmul.f32 %v3718_v26, %v3714_v60  ;;  %v1321_v13 = vpop.permute.xlu0 %1320  ;;  %v4462_v60 = vld [vmem:[%s4522_s11] ss:$0 sm:$0xff]  ;;  %s3234_s11 = sshll.u32 %s3917_s10, 4  ;;  %s3235_s11 = int_to_ptr.vmem [resolvable:$true] %s3234_s11 }
0x11e6   :  { %1327 = vst.msk [vmem:[#allocation2] sm:$0xff] %vm1326_vm4, %v1321_v13  ;;  %s3841_s7 = scalar_lea.vmem %s3235_s11, 256  ;;  %p3846_p13 = scmp.lt.s32.totalorder %s3235_s11, %s3235_s11 }
0x11e7   :  { %3593 = vmatmul.mubr.msk.f32.vlgmr.msra.gmra.mrb[34].mxu1 %vm318_vm2, %v2871_v8  ;;  %p3842_p12 = scmp.ne.s32.totalorder %s3235_s11, %s3841_s7  ;;  %p3847_p0 = scmp.lt.s32.totalorder %s3841_s7, %s3841_s7 }
0x11e8   :  { %v3720_v4 = vpop.eup %3719 }
0x11e9   :  { %v2870_v15 = vmul.f32 %v3720_v4, %v3716_v63  ;;  %v1662_v17 = vpop.permute.xlu0 %1661  ;;  %p3848_p1 = por %p3847_p0, %p3846_p13 }
0x11ea   :  { %1668 = vst.msk [vmem:[#allocation2] sm:$0xff] %vm1667_vm5, %v1662_v17 }
0x11eb   :  { %3588 = vmatmul.mubr.msk.f32.vlgmr.msra.gmra.mrb[30].mxu0 %vm318_vm2, %v2870_v15  ;;  %p3849_p2 = pnand %p3848_p1, %p3842_p12 }
0x11ec   :  { %3628 = vmatpush3.bf16.msra.mxu0 %v3625_v11 }
0x11ed   :  { %v2347_v28 = vpop.permute.xlu0 %2346  ;;  %3630 = vmatprep.subr.bf16.mxu0 %v3629_v18 }
0x11ee   :  { %2352 = vst.msk [vmem:[#allocation2 + $0x10] sm:$0xff] %vm985_vm3, %v2347_v28 }
0x11f0   :  { %3632 = vmatpush3.bf16.msra.mxu0 %v3629_v18 }
0x11f1   :  { %v2687_v30 = vpop.permute.xlu0 %2686  ;;  %v3034_v19 = vld [vmem:[#allocation2] sm:$0xff] }
0x11f2   :  { %2692 = vst.msk [vmem:[#allocation2 + $0x10] sm:$0xff] %vm1326_vm4, %v2687_v30  ;;  %3603 = vmatprep.mubr.msk.f32.mxu0 %vm128_vm0, %v3034_v19 }
0x11f3   :  { %3604 = vmatmul.mubr.msk.f32.vlgmr.msra.gmra.mrb[32].mxu0 %vm128_vm0, %v3035_v20 }
0x12ba   :  { %v3020_v21 = vpop.f32.mrb[34].mxu1 }
0x12bb   :  { %3028 = vrot.lane.b32.xlu1 %v3020_v21, %s3916_s8  ;;  %v3594_v23 = vpop.f32.mrb[35].mxu1 }
0x12be   :  { %v2944_v27 = vpop.f32.mrb[30].mxu0 }
0x12bf   :  { %3026 = vrot.lane.b32.xlu0 %v2944_v27, %s3916_s8  ;;  %v3589_v29 = vpop.f32.mrb[31].mxu0 }
0x12c6   :  { %v3605_v22 = vpop.f32.mrb[32].mxu0 }
0x12c7   :  { %v3127_v31 = vpop.f32.mrb[33].mxu0  ;;  %v3133_v34 = vadd.f32 %v3605_v22, %v3322_v32 }
0x12c8   :  { %v3128_v33 = vadd.f32 %v3322_v32, %v3127_v31 }
0x12c9   :  { %v3147_v40 = vadd.f32 %v3730_v39, %v3133_v34 }
0x12ca   :  { %v3146_v37 = vadd.f32 %v3729_v35, %v3128_v33 }
0x12cb   :  { %v3153_v24 = vsel %vm128_vm0, %v3147_v40, 0.0 }
0x12cc   :  { %v3150_v41 = vsel %vm128_vm0, %v3146_v37, 0.0 }
0x12de   :  { %3151 = vadd.xlane.f32.xlu0 %v3150_v41 }
0x12df   :  { %3154 = vadd.xlane.f32.xlu1 %v3153_v24 }
0x132d   :  { %v3029_v42 = vpop.permute.xlu1 %3028 }
0x132e   :  { %3033 = vst.msk [vmem:[#allocation2 + $0x18] sm:$0xff] %vm1667_vm5, %v3029_v42 }
0x1331   :  { %v3027_v43 = vpop.permute.xlu0 %3026 }
0x1332   :  { %3032 = vst.msk [vmem:[#allocation2 + $0x10] sm:$0xff] %vm1667_vm5, %v3027_v43 }
0x1335   :  { %v3037_v45 = vld [vmem:[#allocation2 + $0x18] sm:$0xff] }
0x1339   :  { %v3036_v44 = vld [vmem:[#allocation2 + $0x10] sm:$0xff] }
0x133a   :  { %3606 = vmatprep.mubr.msk.f32.mxu0 %vm128_vm0, %v3036_v44 }
0x133b   :  { %3607 = vmatmul.mubr.msk.f32.gmra.mrb[34].mxu0 %vm128_vm0, %v3037_v45 }
0x136b   :  { %v3152_v58 = vpop.xlane.xlu0 %3151 }
0x136c   :  { %v3155_v46 = vpop.xlane.xlu1 %3154  ;;  %v3163_v38 = vmul.f32 0.03125, %v3152_v58 }
0x136d   :  { %v3164_v48 = vmul.f32 0.03125, %v3155_v46 }
0x136e   :  { %v3167_v62 = vsub.f32 %v3146_v37, %v3163_v38 }
0x136f   :  { %v3168_v51 = vsub.f32 %v3147_v40, %v3164_v48 }
0x1370   :  { %v3171_v3 = vmul.f32 %v3167_v62, %v3167_v62 }
0x1371   :  { %v3172_v52 = vmul.f32 %v3168_v51, %v3168_v51 }
0x1372   :  { %v3175_v5 = vsel %vm128_vm0, %v3171_v3, 0.0 }
0x1373   :  { %v3178_v53 = vsel %vm128_vm0, %v3172_v52, 0.0 }
0x1374   :  { %3179 = vadd.xlane.f32.xlu1 %v3178_v53 }
0x1401   :  { %v3180_v54 = vpop.xlane.xlu1 %3179 }
0x1402   :  { %v3188_v56 = vmul.f32 0.03125, %v3180_v54 }
0x1404   :  { %v3192_v57 = vadd.f32 1e-12, %v3188_v56 }
0x1406   :  { %3721 = vrsqrt.f32 %v3192_v57 }
0x140e   :  { %v3608_v16 = vpop.f32.mrb[34].mxu0 }
0x140f   :  { %v3137_v25 = vpop.f32.mrb[35].mxu0  ;;  %v3143_v55 = vadd.f32 %v3608_v16, %v3322_v32 }
0x1410   :  { %v3722_v49 = vpop.eup %3721  ;;  %v3138_v36 = vadd.f32 %v3322_v32, %v3137_v25 }
0x1411   :  { %v3200_v6 = vmul.f32 %v3722_v49, %v3168_v51  ;;  %v3149_v0 = vadd.f32 %v3730_v39, %v3143_v55 }
0x1412   :  { %v3148_v47 = vadd.f32 %v3729_v35, %v3138_v36 }
0x1413   :  { %v3211_v61 = vmul.f32 %v4457_v59, %v3200_v6  ;;  %v3159_v2 = vsel %vm128_vm0, %v3149_v0, 0.0 }
0x1414   :  { %v3156_v63 = vsel %vm128_vm0, %v3148_v47, 0.0 }
0x1415   :  { %3157 = vadd.xlane.f32.xlu0 %v3156_v63  ;;  %v3222_v1 = vadd.f32 %v4462_v60, %v3211_v61 }
0x1417   :  { %3226 = vst.msk [vmem:[#allocation12 + $0x8] sm:$0xff] %vm128_vm0, %v3222_v1 }
0x1419   :  { %3160 = vadd.xlane.f32.xlu0 %v3159_v2 }
0x141d   :  { %3176 = vadd.xlane.f32.xlu0 %v3175_v5 }
0x14a2   :  { %v3158_v7 = vpop.xlane.xlu0 %3157 }
0x14a3   :  { %v3165_v9 = vmul.f32 0.03125, %v3158_v7 }
0x14a5   :  { %v3169_v10 = vsub.f32 %v3148_v47, %v3165_v9 }
0x14a6   :  { %v3161_v11 = vpop.xlane.xlu0 %3160 }
0x14a7   :  { %v3166_v12 = vmul.f32 0.03125, %v3161_v11  ;;  %v3173_v26 = vmul.f32 %v3169_v10, %v3169_v10 }
0x14a9   :  { %v3170_v8 = vsub.f32 %v3149_v0, %v3166_v12  ;;  %v3181_v13 = vsel %vm128_vm0, %v3173_v26, 0.0 }
0x14aa   :  { %3182 = vadd.xlane.f32.xlu0 %v3181_v13  ;;  %v3177_v50 = vpop.xlane.xlu0 %3176 }
0x14ab   :  { %v3187_v14 = vmul.f32 0.03125, %v3177_v50  ;;  %v3174_v4 = vmul.f32 %v3170_v8, %v3170_v8 }
0x14ad   :  { %v3191_v15 = vadd.f32 1e-12, %v3187_v14  ;;  %v3184_v17 = vsel %vm128_vm0, %v3174_v4, 0.0 }
0x14ae   :  { %3185 = vadd.xlane.f32.xlu1 %v3184_v17 }
0x14af   :  { %3723 = vrsqrt.f32 %v3191_v15 }
0x14b9   :  { %v3724_v18 = vpop.eup %3723 }
0x14ba   :  { %v3199_v28 = vmul.f32 %v3724_v18, %v3167_v62 }
0x14bc   :  { %v3210_v30 = vmul.f32 %v4457_v59, %v3199_v28 }
0x14be   :  { %v3221_v19 = vadd.f32 %v4462_v60, %v3210_v30 }
0x14c0   :  { %3225 = vst.msk [vmem:[#allocation12] sm:$0xff] %vm128_vm0, %v3221_v19 }
0x14c1   :  { %3852 = shalt.err (!%p3849_p2)
}
0x14c2   :  { %s3853_s18 = scalar_lea.hbm %s4523_s12, 256 }
0x14c3   :  { %p3854_p3 = scmp.ne.s32.totalorder %s4523_s12, %s3853_s18  ;;  %p3857_p4 = scmp.lt.u32.totalorder %s3853_s18, %s4523_s12 }
0x14c5   :  { %p3859_p5 = pnand %p3857_p4, %p3854_p3 }
0x14c7   :  { %3862 = shalt.err (!%p3859_p5)
}
0x14c8   :  { %3240 = dma.vmem_to_hbm [thread:$0]  %s3235_s11, 256, %s4523_s12, [#allocation5], %s3897_s20, %s3897_s20, %s3898_s21  }
0x14c9   :  { %s3918_s28 = smov [#allocation13]  }
0x14ca   :  { %s3246_s15 = sshll.u32 %s3918_s28, 4  ;;  %s3247_s15 = int_to_ptr.vmem [resolvable:$true] %s3246_s15 }
0x14cb   :  { %s3863_s12 = scalar_lea.vmem %s3247_s15, 256  ;;  %p3868_p7 = scmp.lt.s32.totalorder %s3247_s15, %s3247_s15 }
0x14cc   :  { %p3864_p6 = scmp.ne.s32.totalorder %s3247_s15, %s3863_s12  ;;  %p3869_p8 = scmp.lt.s32.totalorder %s3863_s12, %s3863_s12 }
0x14ce   :  { %p3870_p9 = por %p3869_p8, %p3868_p7 }
0x14d0   :  { %p3871_p10 = pnand %p3870_p9, %p3864_p6 }
0x1537   :  { %v3183_v20 = vpop.xlane.xlu0 %3182 }
0x1538   :  { %v3189_v21 = vmul.f32 0.03125, %v3183_v20 }
0x153a   :  { %v3193_v23 = vadd.f32 1e-12, %v3189_v21 }
0x153b   :  { %v3186_v27 = vpop.xlane.xlu1 %3185 }
0x153c   :  { %3725 = vrsqrt.f32 %v3193_v23  ;;  %v3190_v29 = vmul.f32 0.03125, %v3186_v27 }
0x153e   :  { %v3194_v22 = vadd.f32 1e-12, %v3190_v29 }
0x1540   :  { %3727 = vrsqrt.f32 %v3194_v22 }
0x1546   :  { %v3726_v31 = vpop.eup %3725 }
0x1547   :  { %v3201_v32 = vmul.f32 %v3726_v31, %v3169_v10 }
0x1549   :  { %v3212_v33 = vmul.f32 %v4457_v59, %v3201_v32 }
0x154a   :  { %v3728_v34 = vpop.eup %3727 }
0x154b   :  { %v3202_v35 = vmul.f32 %v3728_v34, %v3170_v8  ;;  %v3223_v37 = vadd.f32 %v4462_v60, %v3212_v33 }
0x154d   :  { %v3213_v39 = vmul.f32 %v4457_v59, %v3202_v35  ;;  %3227 = vst.msk [vmem:[#allocation13] sm:$0xff] %vm128_vm0, %v3223_v37 }
0x154f   :  { %v3224_v40 = vadd.f32 %v4462_v60, %v3213_v39 }
0x1551   :  { %3228 = vst.msk [vmem:[#allocation13 + $0x8] sm:$0xff] %vm128_vm0, %v3224_v40 }
0x1552   :  { %3874 = shalt.err (!%p3871_p10)
}
0x1553   :  { %s3875_s3 = scalar_lea.hbm %s4524_s13, 256 }
0x1554   :  { %p3876_p11 = scmp.ne.s32.totalorder %s4524_s13, %s3875_s3  ;;  %p3879_p12 = scmp.lt.u32.totalorder %s3875_s3, %s4524_s13 }
0x1556   :  { %p3881_p13 = pnand %p3879_p12, %p3876_p11 }
0x1558   :  { %3884 = shalt.err (!%p3881_p13)
}
0x1559   :  { %3252 = dma.vmem_to_hbm [thread:$0]  %s3247_s15, 256, %s4524_s13, [#allocation14], %s3897_s20, %s3897_s20, %s3898_s21  }
0x155a   :  { %3891 = dma.done.wait [#allocation5], 256  }
0x155b   :  { %3892 = vsyncadd [#allocation5], 4294967040 }
0x155c   :  { %3893 = dma.done.wait [#allocation14], 256  }
0x155d   :  { %3894 = vsyncadd [#allocation14], 4294967040 }
0x155e   :  { %3259 = vsyncpa [#allocation4], 1 }
0x155f   :  { %3260 = vsyncpa [#allocation7], 1 }
0x1560   :  { %3261 = vsyncpa [#allocation10], 1 }
0x1561   :  { %3262 = vsyncpa [#allocation5], 1 }
0x1562   :  { %3263 = vsyncpa [#allocation14], 1 }

</bundles_post_ra>
